<compile_context>
chip_gen: v7x
topology: tpu7x:2x2x1
jax: 0.10.0
libtpu: 0.0.40
codegen_flags: <defaults>
</compile_context>

<pallas_src>
import functools

import jax
import jax.numpy as jnp
import numpy as np
from jax.experimental import pallas as pl
from jax.experimental.pallas import tpu as pltpu

EPS = 1e-8
NUM_HEADS = 4
_N_MOM = 5          # Σs, Σe, Σs², Σe², Σs·e
_OUT_COLS = 6       # 5 moments + fused CE value


def _vmem_capacity_bytes():
    try:
        return int(pltpu.get_tpu_info().vmem_capacity_bytes)
    except Exception:
        # Conservative fallback (v7x has 64 MiB physical VMEM per core).
        return 64 * 1024 * 1024


# ----------------------------------------------------------------------------
# Fused kernel: streaming SI-SNR moments + 4-head CE epilogue.
#   grid = (num_core_splits [parallel], tiles_per_core [arbitrary])
# ----------------------------------------------------------------------------
def _muse_moments_kernel(
    src_ref, est_ref, logits_ref, tgt_ref,          # inputs
    mom_ref,                                        # output (1, rows, 6)
    ss_ref, se_ref, sss_ref, see_ref, sse_ref,      # VMEM (rows, 1) accumulators
    *, rows, ce_batch, tiles_per_core, tile_cols, valid_cols, needs_mask,
):
    c = pl.program_id(0)          # core-split index  ("parallel")
    k = pl.program_id(1)          # time-tile index    ("arbitrary")

    # ---- init accumulators on each core's first time tile -------------------
    @pl.when(k == 0)
    def _init():
        z = jnp.zeros_like(ss_ref)
        ss_ref[...] = z
        se_ref[...] = z
        sss_ref[...] = z
        see_ref[...] = z
        sse_ref[...] = z

    s_raw = src_ref[...].astype(jnp.float32)        # (rows, tile_cols)
    e_raw = est_ref[...].astype(jnp.float32)

    def _accumulate(s, e):
        ss_ref[...] += jnp.sum(s, axis=-1, keepdims=True)
        se_ref[...] += jnp.sum(e, axis=-1, keepdims=True)
        sss_ref[...] += jnp.sum(s * s, axis=-1, keepdims=True)
        see_ref[...] += jnp.sum(e * e, axis=-1, keepdims=True)
        sse_ref[...] += jnp.sum(s * e, axis=-1, keepdims=True)

    if not needs_mask:
        # Every tile of the grid is fully in range: unmasked hot loop.
        _accumulate(s_raw, e_raw)
    else:
        # Mask only the ragged / fully-out-of-range tail tiles; the full tiles
        # stay on the unmasked fast path (mask hoisted out of the hot loop).
        tile_start = (c * tiles_per_core + k) * tile_cols
        is_full = tile_start + tile_cols <= valid_cols

        @pl.when(is_full)
        def _full():
            _accumulate(s_raw, e_raw)

        @pl.when(jnp.logical_not(is_full))
        def _partial():
            # Mask BEFORE any arithmetic: lanes past `valid_cols` hold
            # unspecified pad data from the ragged DMA.
            col = jax.lax.broadcasted_iota(jnp.int32, s_raw.shape, 1)
            limit = valid_cols - tile_start       # <= 0 for fully-OOB tiles
            m = col < limit
            _accumulate(jnp.where(m, s_raw, 0.0), jnp.where(m, e_raw, 0.0))

    # ---- finalize on each core's last time tile ------------------------------
    @pl.when(k == pl.num_programs(1) - 1)
    def _finalize():
        # 4-head cross entropy, one vectorized (4B, C) pass over the resident
        # logits block (tiny; recomputed identically on each core split).
        logits = logits_ref[...].astype(jnp.float32)      # (4B, C)
        tgt = tgt_ref[...]                                # (4B, 1) int32
        classes = jax.lax.broadcasted_iota(jnp.int32, logits.shape, 1)
        onehot = (classes == tgt).astype(jnp.float32)
        mmax = jnp.max(logits, axis=-1, keepdims=True)
        lse = jnp.log(jnp.sum(jnp.exp(logits - mmax), axis=-1, keepdims=True)) + mmax
        tgt_logit = jnp.sum(logits * onehot, axis=-1, keepdims=True)
        # sum over 4 heads of mean-over-batch CE == sum(all rows) / batch
        ce = jnp.sum(lse - tgt_logit) / ce_batch
        ce_col = jnp.full((rows, 1), ce, dtype=jnp.float32)

        mom_ref[0] = jnp.concatenate(
            [ss_ref[...], se_ref[...], sss_ref[...], see_ref[...], sse_ref[...],
             ce_col],
            axis=-1,
        )


# ----------------------------------------------------------------------------
# MuSE_loss forward
# ----------------------------------------------------------------------------
def muse_loss(tgt_wav, pred_wav, tgt_spk, pred_spk, *, block_elems=None):
    # Flatten any extra leading dims (the reference mean is over all of them).
    if tgt_wav.ndim > 2:
        tgt_wav = tgt_wav.reshape(-1, tgt_wav.shape[-1])
        pred_wav = pred_wav.reshape(-1, pred_wav.shape[-1])

    batch = tgt_wav.shape[0]
    t_src, t_est = tgt_wav.shape[-1], pred_wav.shape[-1]
    t = min(t_src, t_est)        # PyTorch truncates to the shorter length.

    if t_src != t_est and t < 128:
        # Degenerate tiny mismatch: materialize the (negligible) truncation so
        # block shapes stay legal.
        tgt_wav, pred_wav = tgt_wav[..., :t], pred_wav[..., :t]
        t_src = t_est = t

    if t_src == t_est:
        # Sublane fold (free reshape): small batches fill all 8 sublanes.
        fold = next((f for f in (8, 4, 2) if t % f == 0), 1)
        rows, cols = batch * fold, t // fold
        src_k = tgt_wav.reshape(rows, cols)
        est_k = pred_wav.reshape(rows, cols)
    else:
        # Mismatched lengths: stream the ORIGINAL arrays (no truncation copy);
        # the kernel masks columns >= t. No fold (reshape would force a copy).
        fold = 1
        rows, cols = batch, t
        src_k, est_k = tgt_wav, pred_wav

    # ---- generation-aware tile sizing ---------------------------------------
    vmem = _vmem_capacity_bytes()
    vmem_limit = int(min(96 << 20, max(32 << 20, (vmem * 3) // 4)))
    itemsize = max(src_k.dtype.itemsize, est_k.dtype.itemsize)
    auto = block_elems is None
    if auto:
        # 2 inputs x 2 pipeline buffers of this size stay ~<= 50% of VMEM.
        block_bytes = min(16 << 20, max(2 << 20, vmem // 10))
        block_elems = block_bytes // itemsize

    max_tile = (cols // 128) * 128            # largest 128-multiple <= cols
    if max_tile == 0:
        tile_cols = cols                      # tiny input: one full-width tile
    else:
        budget_cols = max(128, (block_elems // max(rows, 1) // 128) * 128)
        tile_cols = min(budget_cols, max_tile)
        if auto:
            # Protect DMA run length (>= 4 KB contiguous per row when possible).
            tile_cols = max(tile_cols, min(1024, max_tile))
    # TODO(synk): for very large `rows` (rows*1024*4B > block budget) add a
    # row-block grid axis instead of shrinking tile_cols further.

    kt = pl.cdiv(cols, tile_cols)             # actual time tiles
    nc = 2 if kt >= 2 else 1                  # core splits (v7x has 2 TCs;
    kpc = pl.cdiv(kt, nc)                     #  harmless serialization elsewhere)
    needs_clamp = nc * kpc > kt
    needs_mask = needs_clamp or (cols % tile_cols != 0)
    last_blk = kt - 1

    if needs_clamp:
        def wav_map(c, k):                    # keep DMA in-bounds for OOB tiles
            return (0, jnp.minimum(c * kpc + k, last_blk))
    else:
        def wav_map(c, k):
            return (0, c * kpc + k)

    # Stack the 4 speaker heads: (4B, C); tile targets to (4B, 1).
    logits = jnp.concatenate(list(pred_spk), axis=0)       # native dtype
    ce_batch = pred_spk[0].shape[0]
    n_cls = logits.shape[-1]
    tgt2d = jnp.tile(tgt_spk.astype(jnp.int32).reshape(ce_batch, 1),
                     (NUM_HEADS, 1))

    kernel = functools.partial(
        _muse_moments_kernel,
        rows=rows, ce_batch=ce_batch, tiles_per_core=kpc,
        tile_cols=tile_cols, valid_cols=cols, needs_mask=needs_mask,
    )

    mom = pl.pallas_call(
        kernel,
        out_shape=jax.ShapeDtypeStruct((nc, rows, _OUT_COLS), jnp.float32),
        grid=(nc, kpc),
        in_specs=[
            pl.BlockSpec((rows, tile_cols), wav_map),
            pl.BlockSpec((rows, tile_cols), wav_map),
            # CE inputs: tiny resident blocks (DMA'd once per core).
            pl.BlockSpec((NUM_HEADS * ce_batch, n_cls), lambda c, k: (0, 0)),
            pl.BlockSpec((NUM_HEADS * ce_batch, 1), lambda c, k: (0, 0)),
        ],
        out_specs=pl.BlockSpec((1, rows, _OUT_COLS), lambda c, k: (c, 0, 0)),
        scratch_shapes=[pltpu.VMEM((rows, 1), jnp.float32) for _ in range(_N_MOM)],
        compiler_params=pltpu.CompilerParams(
            dimension_semantics=("parallel", "arbitrary"),
            vmem_limit_bytes=vmem_limit,
        ),
    )(src_k, est_k, logits, tgt2d)

    # ---- tiny epilogue in plain JAX (combines the per-core partial moments) --
    ce = mom[0, 0, _N_MOM]
    m = jnp.sum(mom[:, :, :_N_MOM], axis=0)            # (rows, 5)
    m = m.reshape(batch, fold, _N_MOM).sum(axis=1)      # (batch, 5)
    s_sum, e_sum, ss_sum, ee_sum, se_sum = (m[:, i] for i in range(_N_MOM))

    inv_t = jnp.float32(1.0 / t)
    s0s0 = ss_sum - s_sum * s_sum * inv_t                # Σ s0²
    e0e0 = ee_sum - e_sum * e_sum * inv_t                # Σ e0²
    dot = se_sum - s_sum * e_sum * inv_t                 # Σ s0·e0
    alpha = dot / (s0s0 + EPS)
    num = alpha * alpha * s0s0                           # Σ proj²
    den = e0e0 - 2.0 * alpha * dot + num                 # Σ (e0 - proj)²
    ratio = num / (den + EPS)
    si_snr = -jnp.mean(10.0 * jnp.log10(ratio + EPS))

    return {"si_snr": si_snr, "ce": ce}


# ----------------------------------------------------------------------------
# Pure-JAX reference (numerical check)
# ----------------------------------------------------------------------------
def _ref_si_snr(source, estimate):
    t = min(source.shape[-1], estimate.shape[-1])
    s = source[..., :t] - jnp.mean(source[..., :t], axis=-1, keepdims=True)
    e = estimate[..., :t] - jnp.mean(estimate[..., :t], axis=-1, keepdims=True)
    ref_energy = jnp.sum(s ** 2, axis=-1, keepdims=True) + EPS
    proj = jnp.sum(s * e, axis=-1, keepdims=True) * s / ref_energy
    noise = e - proj
    ratio = jnp.sum(proj ** 2, axis=-1) / (jnp.sum(noise ** 2, axis=-1) + EPS)
    return -jnp.mean(10.0 * jnp.log10(ratio + EPS))


def _ref_ce(pred_spk, tgt_spk):
    total = 0.0
    for logits in pred_spk:
        logp = jax.nn.log_softmax(logits.astype(jnp.float32), axis=-1)
        nll = -jnp.take_along_axis(logp, tgt_spk[:, None], axis=-1)[:, 0]
        total = total + jnp.mean(nll)
    return total


if __name__ == "__main__":
    key = jax.random.PRNGKey(0)
    k1, k2, k3, k4, k5, k6 = jax.random.split(key, 6)

    B, N_SPK = 2, 16

    tgt_spk = jax.random.randint(k3, (B,), 0, N_SPK, dtype=jnp.int32)
    pred_spk = [jax.random.normal(kk, (B, N_SPK), dtype=jnp.float32)
                for kk in jax.random.split(k4, NUM_HEADS)]
    ref_ce = _ref_ce(pred_spk, tgt_spk)

    # Case 1: mismatched lengths -> no-copy streaming path; small block
    # override forces multi-tile, the core split, and the masked tail tiles.
    tgt_wav = jax.random.normal(k1, (B, 6400), dtype=jnp.float32)
    pred_wav = jax.random.normal(k2, (B, 6272), dtype=jnp.float32)
    out1 = muse_loss(tgt_wav, pred_wav, tgt_spk, pred_spk, block_elems=2048)
    out1 = jax.tree_util.tree_map(jax.block_until_ready, out1)
    np.testing.assert_allclose(np.asarray(out1["si_snr"]),
                               np.asarray(_ref_si_snr(tgt_wav, pred_wav)),
                               rtol=1e-3, atol=1e-3)
    np.testing.assert_allclose(np.asarray(out1["ce"]), np.asarray(ref_ce),
                               rtol=1e-3, atol=1e-3)

    # Case 2: equal lengths -> sublane-fold path with a ragged last tile.
    tgt2 = jax.random.normal(k5, (B, 4224), dtype=jnp.float32)
    pred2 = jax.random.normal(k6, (B, 4224), dtype=jnp.float32)
    ref_si2 = _ref_si_snr(tgt2, pred2)
    out2 = muse_loss(tgt2, pred2, tgt_spk, pred_spk, block_elems=4096)
    out2 = jax.tree_util.tree_map(jax.block_until_ready, out2)
    np.testing.assert_allclose(np.asarray(out2["si_snr"]), np.asarray(ref_si2),
                               rtol=1e-3, atol=1e-3)
    np.testing.assert_allclose(np.asarray(out2["ce"]), np.asarray(ref_ce),
                               rtol=1e-3, atol=1e-3)

    # Case 3: automatic (generation-aware) tile sizing.
    out3 = muse_loss(tgt2, pred2, tgt_spk, pred_spk)
    out3 = jax.tree_util.tree_map(jax.block_until_ready, out3)
    np.testing.assert_allclose(np.asarray(out3["si_snr"]), np.asarray(ref_si2),
                               rtol=1e-3, atol=1e-3)
    np.testing.assert_allclose(np.asarray(out3["ce"]), np.asarray(ref_ce),
                               rtol=1e-3, atol=1e-3)

    print("KERNEL_OK")
</pallas_src>

<mosaic_0001>
module attributes {stable_mosaic.version = 11 : i64} {
  func.func @_muse_moments_kernel(%arg0: i32, %arg1: i32, %arg2: memref<2x1024xf32, #tpu.memory_space<vmem>>, %arg3: memref<2x1024xf32, #tpu.memory_space<vmem>>, %arg4: memref<8x16xf32, #tpu.memory_space<vmem>>, %arg5: memref<8x1xi32, #tpu.memory_space<vmem>>, %arg6: memref<1x2x6xf32, #tpu.memory_space<vmem>>, %arg7: memref<2x1xf32, #tpu.memory_space<vmem>>, %arg8: memref<2x1xf32, #tpu.memory_space<vmem>>, %arg9: memref<2x1xf32, #tpu.memory_space<vmem>>, %arg10: memref<2x1xf32, #tpu.memory_space<vmem>>, %arg11: memref<2x1xf32, #tpu.memory_space<vmem>>) attributes {dimension_semantics = [#tpu.dimension_semantics<parallel>, #tpu.dimension_semantics<arbitrary>], iteration_bounds = array<i64: 2, 4>, scalar_prefetch = 0 : i64, scratch_operands = 5 : i64, tpu.core_type = #tpu.core_type<tc>, window_params = [{transform_indices = @transform_0, window_bounds = array<i64: 2, 1024>}, {transform_indices = @transform_1, window_bounds = array<i64: 2, 1024>}, {pipeline_mode = #tpu.pipeline_mode<synchronous>, transform_indices = @transform_2, window_bounds = array<i64: 8, 16>}, {pipeline_mode = #tpu.pipeline_mode<synchronous>, transform_indices = @transform_3, window_bounds = array<i64: 8, 1>}, {transform_indices = @transform_4, window_bounds = array<i64: 1, 2, 6>}]} {
    %c0_i32 = arith.constant 0 : i32
    %0 = arith.cmpi eq, %arg1, %c0_i32 : i32
    %1 = arith.extui %0 : i1 to i32
    %c0_i32_0 = arith.constant 0 : i32
    %2 = arith.cmpi ne, %1, %c0_i32_0 : i32
    scf.if %2 {
      %cst = arith.constant 0.000000e+00 : f32
      %18 = vector.broadcast %cst : f32 to vector<2x1xf32>
      %c0_8 = arith.constant 0 : index
      %c0_9 = arith.constant 0 : index
      %19 = vector.load %arg7[%c0_8, %c0_9] : memref<2x1xf32, #tpu.memory_space<vmem>>, vector<2x1xf32>
      tpu.vector_store %arg7[%c0_8, %c0_9], %18 {strides = array<i32>} : memref<2x1xf32, #tpu.memory_space<vmem>>, vector<2x1xf32>,
      %c0_10 = arith.constant 0 : index
      %c0_11 = arith.constant 0 : index
      %20 = vector.load %arg8[%c0_10, %c0_11] : memref<2x1xf32, #tpu.memory_space<vmem>>, vector<2x1xf32>
      tpu.vector_store %arg8[%c0_10, %c0_11], %18 {strides = array<i32>} : memref<2x1xf32, #tpu.memory_space<vmem>>, vector<2x1xf32>,
      %c0_12 = arith.constant 0 : index
      %c0_13 = arith.constant 0 : index
      %21 = vector.load %arg9[%c0_12, %c0_13] : memref<2x1xf32, #tpu.memory_space<vmem>>, vector<2x1xf32>
      tpu.vector_store %arg9[%c0_12, %c0_13], %18 {strides = array<i32>} : memref<2x1xf32, #tpu.memory_space<vmem>>, vector<2x1xf32>,
      %c0_14 = arith.constant 0 : index
      %c0_15 = arith.constant 0 : index
      %22 = vector.load %arg10[%c0_14, %c0_15] : memref<2x1xf32, #tpu.memory_space<vmem>>, vector<2x1xf32>
      tpu.vector_store %arg10[%c0_14, %c0_15], %18 {strides = array<i32>} : memref<2x1xf32, #tpu.memory_space<vmem>>, vector<2x1xf32>,
      %c0_16 = arith.constant 0 : index
      %c0_17 = arith.constant 0 : index
      %23 = vector.load %arg11[%c0_16, %c0_17] : memref<2x1xf32, #tpu.memory_space<vmem>>, vector<2x1xf32>
      tpu.vector_store %arg11[%c0_16, %c0_17], %18 {strides = array<i32>} : memref<2x1xf32, #tpu.memory_space<vmem>>, vector<2x1xf32>,
    } else {
    }
    %c0 = arith.constant 0 : index
    %c0_1 = arith.constant 0 : index
    %3 = vector.load %arg2[%c0, %c0_1] : memref<2x1024xf32, #tpu.memory_space<vmem>>, vector<2x1024xf32>
    %c0_2 = arith.constant 0 : index
    %c0_3 = arith.constant 0 : index
    %4 = vector.load %arg3[%c0_2, %c0_3] : memref<2x1024xf32, #tpu.memory_space<vmem>>, vector<2x1024xf32>
    %c4_i32 = arith.constant 4 : i32
    %5 = arith.muli %arg0, %c4_i32 : i32
    %6 = arith.addi %5, %arg1 : i32
    %c1024_i32 = arith.constant 1024 : i32
    %7 = arith.muli %6, %c1024_i32 : i32
    %c1024_i32_4 = arith.constant 1024 : i32
    %8 = arith.addi %7, %c1024_i32_4 : i32
    %c6272_i32 = arith.constant 6272 : i32
    %9 = arith.cmpi sle, %8, %c6272_i32 : i32
    %10 = arith.extui %9 : i1 to i32
    %c0_i32_5 = arith.constant 0 : i32
    %11 = arith.cmpi ne, %10, %c0_i32_5 : i32
    scf.if %11 {
      %c0_8 = arith.constant 0 : index
      %c0_9 = arith.constant 0 : index
      %18 = vector.load %arg7[%c0_8, %c0_9] : memref<2x1xf32, #tpu.memory_space<vmem>>, vector<2x1xf32>
      %cst = arith.constant dense<0.000000e+00> : vector<2xf32>
      %19 = vector.multi_reduction <add>, %3, %cst [1] : vector<2x1024xf32> to vector<2xf32>
      %20 = vector.shape_cast %19 : vector<2xf32> to vector<2x1xf32>
      %21 = arith.addf %18, %20 : vector<2x1xf32>
      %c0_10 = arith.constant 0 : index
      %c0_11 = arith.constant 0 : index
      %22 = vector.load %arg7[%c0_10, %c0_11] : memref<2x1xf32, #tpu.memory_space<vmem>>, vector<2x1xf32>
      tpu.vector_store %arg7[%c0_10, %c0_11], %21 {strides = array<i32>} : memref<2x1xf32, #tpu.memory_space<vmem>>, vector<2x1xf32>,
      %c0_12 = arith.constant 0 : index
      %c0_13 = arith.constant 0 : index
      %23 = vector.load %arg8[%c0_12, %c0_13] : memref<2x1xf32, #tpu.memory_space<vmem>>, vector<2x1xf32>
      %cst_14 = arith.constant dense<0.000000e+00> : vector<2xf32>
      %24 = vector.multi_reduction <add>, %4, %cst_14 [1] : vector<2x1024xf32> to vector<2xf32>
      %25 = vector.shape_cast %24 : vector<2xf32> to vector<2x1xf32>
      %26 = arith.addf %23, %25 : vector<2x1xf32>
      %c0_15 = arith.constant 0 : index
      %c0_16 = arith.constant 0 : index
      %27 = vector.load %arg8[%c0_15, %c0_16] : memref<2x1xf32, #tpu.memory_space<vmem>>, vector<2x1xf32>
      tpu.vector_store %arg8[%c0_15, %c0_16], %26 {strides = array<i32>} : memref<2x1xf32, #tpu.memory_space<vmem>>, vector<2x1xf32>,
      %c0_17 = arith.constant 0 : index
      %c0_18 = arith.constant 0 : index
      %28 = vector.load %arg9[%c0_17, %c0_18] : memref<2x1xf32, #tpu.memory_space<vmem>>, vector<2x1xf32>
      %29 = arith.mulf %3, %3 : vector<2x1024xf32>
      %cst_19 = arith.constant dense<0.000000e+00> : vector<2xf32>
      %30 = vector.multi_reduction <add>, %29, %cst_19 [1] : vector<2x1024xf32> to vector<2xf32>
      %31 = vector.shape_cast %30 : vector<2xf32> to vector<2x1xf32>
      %32 = arith.addf %28, %31 : vector<2x1xf32>
      %c0_20 = arith.constant 0 : index
      %c0_21 = arith.constant 0 : index
      %33 = vector.load %arg9[%c0_20, %c0_21] : memref<2x1xf32, #tpu.memory_space<vmem>>, vector<2x1xf32>
      tpu.vector_store %arg9[%c0_20, %c0_21], %32 {strides = array<i32>} : memref<2x1xf32, #tpu.memory_space<vmem>>, vector<2x1xf32>,
      %c0_22 = arith.constant 0 : index
      %c0_23 = arith.constant 0 : index
      %34 = vector.load %arg10[%c0_22, %c0_23] : memref<2x1xf32, #tpu.memory_space<vmem>>, vector<2x1xf32>
      %35 = arith.mulf %4, %4 : vector<2x1024xf32>
      %cst_24 = arith.constant dense<0.000000e+00> : vector<2xf32>
      %36 = vector.multi_reduction <add>, %35, %cst_24 [1] : vector<2x1024xf32> to vector<2xf32>
      %37 = vector.shape_cast %36 : vector<2xf32> to vector<2x1xf32>
      %38 = arith.addf %34, %37 : vector<2x1xf32>
      %c0_25 = arith.constant 0 : index
      %c0_26 = arith.constant 0 : index
      %39 = vector.load %arg10[%c0_25, %c0_26] : memref<2x1xf32, #tpu.memory_space<vmem>>, vector<2x1xf32>
      tpu.vector_store %arg10[%c0_25, %c0_26], %38 {strides = array<i32>} : memref<2x1xf32, #tpu.memory_space<vmem>>, vector<2x1xf32>,
      %c0_27 = arith.constant 0 : index
      %c0_28 = arith.constant 0 : index
      %40 = vector.load %arg11[%c0_27, %c0_28] : memref<2x1xf32, #tpu.memory_space<vmem>>, vector<2x1xf32>
      %41 = arith.mulf %3, %4 : vector<2x1024xf32>
      %cst_29 = arith.constant dense<0.000000e+00> : vector<2xf32>
      %42 = vector.multi_reduction <add>, %41, %cst_29 [1] : vector<2x1024xf32> to vector<2xf32>
      %43 = vector.shape_cast %42 : vector<2xf32> to vector<2x1xf32>
      %44 = arith.addf %40, %43 : vector<2x1xf32>
      %c0_30 = arith.constant 0 : index
      %c0_31 = arith.constant 0 : index
      %45 = vector.load %arg11[%c0_30, %c0_31] : memref<2x1xf32, #tpu.memory_space<vmem>>, vector<2x1xf32>
      tpu.vector_store %arg11[%c0_30, %c0_31], %44 {strides = array<i32>} : memref<2x1xf32, #tpu.memory_space<vmem>>, vector<2x1xf32>,
    } else {
    }
    %true = arith.constant true
    %12 = arith.xori %9, %true : i1
    %13 = arith.extui %12 : i1 to i32
    %c0_i32_6 = arith.constant 0 : i32
    %14 = arith.cmpi ne, %13, %c0_i32_6 : i32
    scf.if %14 {
      %18 = tpu.iota {dimensions = array<i32: 1>} : vector<2x1024xi32>
      %c6272_i32_8 = arith.constant 6272 : i32
      %19 = arith.subi %c6272_i32_8, %7 : i32
      %20 = vector.broadcast %19 : i32 to vector<2x1024xi32>
      %21 = arith.cmpi slt, %18, %20 : vector<2x1024xi32>
      %cst = arith.constant 0.000000e+00 : f32
      %22 = vector.broadcast %cst : f32 to vector<2x1024xf32>
      %23 = arith.select %21, %3, %22 : vector<2x1024xi1>, vector<2x1024xf32>
      %cst_9 = arith.constant 0.000000e+00 : f32
      %24 = vector.broadcast %cst_9 : f32 to vector<2x1024xf32>
      %25 = arith.select %21, %4, %24 : vector<2x1024xi1>, vector<2x1024xf32>
      %c0_10 = arith.constant 0 : index
      %c0_11 = arith.constant 0 : index
      %26 = vector.load %arg7[%c0_10, %c0_11] : memref<2x1xf32, #tpu.memory_space<vmem>>, vector<2x1xf32>
      %cst_12 = arith.constant dense<0.000000e+00> : vector<2xf32>
      %27 = vector.multi_reduction <add>, %23, %cst_12 [1] : vector<2x1024xf32> to vector<2xf32>
      %28 = vector.shape_cast %27 : vector<2xf32> to vector<2x1xf32>
      %29 = arith.addf %26, %28 : vector<2x1xf32>
      %c0_13 = arith.constant 0 : index
      %c0_14 = arith.constant 0 : index
      %30 = vector.load %arg7[%c0_13, %c0_14] : memref<2x1xf32, #tpu.memory_space<vmem>>, vector<2x1xf32>
      tpu.vector_store %arg7[%c0_13, %c0_14], %29 {strides = array<i32>} : memref<2x1xf32, #tpu.memory_space<vmem>>, vector<2x1xf32>,
      %c0_15 = arith.constant 0 : index
      %c0_16 = arith.constant 0 : index
      %31 = vector.load %arg8[%c0_15, %c0_16] : memref<2x1xf32, #tpu.memory_space<vmem>>, vector<2x1xf32>
      %cst_17 = arith.constant dense<0.000000e+00> : vector<2xf32>
      %32 = vector.multi_reduction <add>, %25, %cst_17 [1] : vector<2x1024xf32> to vector<2xf32>
      %33 = vector.shape_cast %32 : vector<2xf32> to vector<2x1xf32>
      %34 = arith.addf %31, %33 : vector<2x1xf32>
      %c0_18 = arith.constant 0 : index
      %c0_19 = arith.constant 0 : index
      %35 = vector.load %arg8[%c0_18, %c0_19] : memref<2x1xf32, #tpu.memory_space<vmem>>, vector<2x1xf32>
      tpu.vector_store %arg8[%c0_18, %c0_19], %34 {strides = array<i32>} : memref<2x1xf32, #tpu.memory_space<vmem>>, vector<2x1xf32>,
      %c0_20 = arith.constant 0 : index
      %c0_21 = arith.constant 0 : index
      %36 = vector.load %arg9[%c0_20, %c0_21] : memref<2x1xf32, #tpu.memory_space<vmem>>, vector<2x1xf32>
      %37 = arith.mulf %23, %23 : vector<2x1024xf32>
      %cst_22 = arith.constant dense<0.000000e+00> : vector<2xf32>
      %38 = vector.multi_reduction <add>, %37, %cst_22 [1] : vector<2x1024xf32> to vector<2xf32>
      %39 = vector.shape_cast %38 : vector<2xf32> to vector<2x1xf32>
      %40 = arith.addf %36, %39 : vector<2x1xf32>
      %c0_23 = arith.constant 0 : index
      %c0_24 = arith.constant 0 : index
      %41 = vector.load %arg9[%c0_23, %c0_24] : memref<2x1xf32, #tpu.memory_space<vmem>>, vector<2x1xf32>
      tpu.vector_store %arg9[%c0_23, %c0_24], %40 {strides = array<i32>} : memref<2x1xf32, #tpu.memory_space<vmem>>, vector<2x1xf32>,
      %c0_25 = arith.constant 0 : index
      %c0_26 = arith.constant 0 : index
      %42 = vector.load %arg10[%c0_25, %c0_26] : memref<2x1xf32, #tpu.memory_space<vmem>>, vector<2x1xf32>
      %43 = arith.mulf %25, %25 : vector<2x1024xf32>
      %cst_27 = arith.constant dense<0.000000e+00> : vector<2xf32>
      %44 = vector.multi_reduction <add>, %43, %cst_27 [1] : vector<2x1024xf32> to vector<2xf32>
      %45 = vector.shape_cast %44 : vector<2xf32> to vector<2x1xf32>
      %46 = arith.addf %42, %45 : vector<2x1xf32>
      %c0_28 = arith.constant 0 : index
      %c0_29 = arith.constant 0 : index
      %47 = vector.load %arg10[%c0_28, %c0_29] : memref<2x1xf32, #tpu.memory_space<vmem>>, vector<2x1xf32>
      tpu.vector_store %arg10[%c0_28, %c0_29], %46 {strides = array<i32>} : memref<2x1xf32, #tpu.memory_space<vmem>>, vector<2x1xf32>,
      %c0_30 = arith.constant 0 : index
      %c0_31 = arith.constant 0 : index
      %48 = vector.load %arg11[%c0_30, %c0_31] : memref<2x1xf32, #tpu.memory_space<vmem>>, vector<2x1xf32>
      %49 = arith.mulf %23, %25 : vector<2x1024xf32>
      %cst_32 = arith.constant dense<0.000000e+00> : vector<2xf32>
      %50 = vector.multi_reduction <add>, %49, %cst_32 [1] : vector<2x1024xf32> to vector<2xf32>
      %51 = vector.shape_cast %50 : vector<2xf32> to vector<2x1xf32>
      %52 = arith.addf %48, %51 : vector<2x1xf32>
      %c0_33 = arith.constant 0 : index
      %c0_34 = arith.constant 0 : index
      %53 = vector.load %arg11[%c0_33, %c0_34] : memref<2x1xf32, #tpu.memory_space<vmem>>, vector<2x1xf32>
      tpu.vector_store %arg11[%c0_33, %c0_34], %52 {strides = array<i32>} : memref<2x1xf32, #tpu.memory_space<vmem>>, vector<2x1xf32>,
    } else {
    }
    %c3_i32 = arith.constant 3 : i32
    %15 = arith.cmpi eq, %arg1, %c3_i32 : i32
    %16 = arith.extui %15 : i1 to i32
    %c0_i32_7 = arith.constant 0 : i32
    %17 = arith.cmpi ne, %16, %c0_i32_7 : i32
    scf.if %17 {
      %c0_8 = arith.constant 0 : index
      %c0_9 = arith.constant 0 : index
      %18 = vector.load %arg4[%c0_8, %c0_9] : memref<8x16xf32, #tpu.memory_space<vmem>>, vector<8x16xf32>
      %c0_10 = arith.constant 0 : index
      %c0_11 = arith.constant 0 : index
      %19 = vector.load %arg5[%c0_10, %c0_11] : memref<8x1xi32, #tpu.memory_space<vmem>>, vector<8x1xi32>
      %20 = tpu.iota {dimensions = array<i32: 1>} : vector<8x16xi32>
      %21 = vector.broadcast %19 : vector<8x1xi32> to vector<8x16xi32>
      %22 = arith.cmpi eq, %20, %21 : vector<8x16xi32>
      %23 = arith.extui %22 : vector<8x16xi1> to vector<8x16xi32>
      %24 = arith.sitofp %23 : vector<8x16xi32> to vector<8x16xf32>
      %cst = arith.constant dense<0xFF800000> : vector<8xf32>
      %25 = vector.multi_reduction <maximumf>, %18, %cst [1] : vector<8x16xf32> to vector<8xf32>
      %26 = vector.shape_cast %25 : vector<8xf32> to vector<8x1xf32>
      %27 = vector.broadcast %26 : vector<8x1xf32> to vector<8x16xf32>
      %28 = arith.subf %18, %27 : vector<8x16xf32>
      %29 = math.exp %28 : vector<8x16xf32>
      %cst_12 = arith.constant dense<0.000000e+00> : vector<8xf32>
      %30 = vector.multi_reduction <add>, %29, %cst_12 [1] : vector<8x16xf32> to vector<8xf32>
      %31 = vector.shape_cast %30 : vector<8xf32> to vector<8x1xf32>
      %32 = math.log %31 : vector<8x1xf32>
      %33 = arith.addf %32, %26 : vector<8x1xf32>
      %34 = arith.mulf %18, %24 : vector<8x16xf32>
      %cst_13 = arith.constant dense<0.000000e+00> : vector<8xf32>
      %35 = vector.multi_reduction <add>, %34, %cst_13 [1] : vector<8x16xf32> to vector<8xf32>
      %36 = vector.shape_cast %35 : vector<8xf32> to vector<8x1xf32>
      %37 = arith.subf %33, %36 : vector<8x1xf32>
      %38 = vector.shape_cast %37 : vector<8x1xf32> to vector<1x8x1xf32>
      %cst_14 = arith.constant dense<0.000000e+00> : vector<1xf32>
      %39 = vector.multi_reduction <add>, %38, %cst_14 [1, 2] : vector<1x8x1xf32> to vector<1xf32>
      %40 = vector.shape_cast %39 : vector<1xf32> to vector<1x1x1xf32>
      %41 = vector.extract %40[0, 0, 0] : f32 from vector<1x1x1xf32>
      %cst_15 = arith.constant 2.000000e+00 : f32
      %42 = arith.divf %41, %cst_15 : f32
      %43 = vector.broadcast %42 : f32 to vector<2x1xf32>
      %c0_16 = arith.constant 0 : index
      %c0_17 = arith.constant 0 : index
      %44 = vector.load %arg7[%c0_16, %c0_17] : memref<2x1xf32, #tpu.memory_space<vmem>>, vector<2x1xf32>
      %c0_18 = arith.constant 0 : index
      %c0_19 = arith.constant 0 : index
      %45 = vector.load %arg8[%c0_18, %c0_19] : memref<2x1xf32, #tpu.memory_space<vmem>>, vector<2x1xf32>
      %c0_20 = arith.constant 0 : index
      %c0_21 = arith.constant 0 : index
      %46 = vector.load %arg9[%c0_20, %c0_21] : memref<2x1xf32, #tpu.memory_space<vmem>>, vector<2x1xf32>
      %c0_22 = arith.constant 0 : index
      %c0_23 = arith.constant 0 : index
      %47 = vector.load %arg10[%c0_22, %c0_23] : memref<2x1xf32, #tpu.memory_space<vmem>>, vector<2x1xf32>
      %c0_24 = arith.constant 0 : index
      %c0_25 = arith.constant 0 : index
      %48 = vector.load %arg11[%c0_24, %c0_25] : memref<2x1xf32, #tpu.memory_space<vmem>>, vector<2x1xf32>
      %49 = tpu.concatenate %44, %45, %46, %47, %48, %43 in 1 : vector<2x1xf32>, vector<2x1xf32>, vector<2x1xf32>, vector<2x1xf32>, vector<2x1xf32>, vector<2x1xf32> -> vector<2x6xf32>
      %c0_26 = arith.constant 0 : index
      %c0_27 = arith.constant 0 : index
      %c0_28 = arith.constant 0 : index
      %50 = vector.load %arg6[%c0_26, %c0_27, %c0_28] : memref<1x2x6xf32, #tpu.memory_space<vmem>>, vector<1x2x6xf32>
      %51 = vector.shape_cast %50 : vector<1x2x6xf32> to vector<2x6xf32>
      %52 = vector.shape_cast %49 : vector<2x6xf32> to vector<1x2x6xf32>
      tpu.vector_store %arg6[%c0_26, %c0_27, %c0_28], %52 {strides = array<i32>} : memref<1x2x6xf32, #tpu.memory_space<vmem>>, vector<1x2x6xf32>,
    } else {
    }
    return
  }
  func.func @transform_0(%arg0: i32, %arg1: i32) -> (i32, i32) {
    %c4_i32 = arith.constant 4 : i32
    %0 = arith.muli %arg0, %c4_i32 : i32
    %1 = arith.addi %0, %arg1 : i32
    %c6_i32 = arith.constant 6 : i32
    %2 = arith.minsi %1, %c6_i32 : i32
    %c0_i32 = arith.constant 0 : i32
    %c0_i32_0 = arith.constant 0 : i32
    return %c0_i32, %2 : i32, i32
  }
  func.func @transform_1(%arg0: i32, %arg1: i32) -> (i32, i32) {
    %c4_i32 = arith.constant 4 : i32
    %0 = arith.muli %arg0, %c4_i32 : i32
    %1 = arith.addi %0, %arg1 : i32
    %c6_i32 = arith.constant 6 : i32
    %2 = arith.minsi %1, %c6_i32 : i32
    %c0_i32 = arith.constant 0 : i32
    %c0_i32_0 = arith.constant 0 : i32
    return %c0_i32, %2 : i32, i32
  }
  func.func @transform_2(%arg0: i32, %arg1: i32) -> (i32, i32) {
    %c0_i32 = arith.constant 0 : i32
    %c0_i32_0 = arith.constant 0 : i32
    %c0_i32_1 = arith.constant 0 : i32
    return %c0_i32, %c0_i32_0 : i32, i32
  }
  func.func @transform_3(%arg0: i32, %arg1: i32) -> (i32, i32) {
    %c0_i32 = arith.constant 0 : i32
    %c0_i32_0 = arith.constant 0 : i32
    %c0_i32_1 = arith.constant 0 : i32
    return %c0_i32, %c0_i32_0 : i32, i32
  }
  func.func @transform_4(%arg0: i32, %arg1: i32) -> (i32, i32, i32) {
    %c0_i32 = arith.constant 0 : i32
    %c0_i32_0 = arith.constant 0 : i32
    %c0_i32_1 = arith.constant 0 : i32
    return %arg0, %c0_i32, %c0_i32_0 : i32, i32, i32
  }
}

</mosaic_0001>

<bundles_post_ra>
// kernel: tpu_custom_call.1
= control target key start
LH: loop header
LB: loop body
LE: loop exit
PB: predicated region body
PF: predicated region fallthrough
CT: control target
= control target key end

     0   :  { %9 = vsyncpa [#allocation8], 0  ;;  %s2112_s0 = inlined_call_operand.hbm [shape: f32[2,6400], index: 0, kind: input, shape index: {}]   ;;  %s2113_s1 = inlined_call_operand.hbm [shape: f32[2,6272], index: 1, kind: input, shape index: {}]   ;;  %s2114_s2 = inlined_call_operand.vmem [shape: f32[8,16], index: 2, kind: input, shape index: {}]   ;;  %s2115_s3 = inlined_call_operand.vmem [shape: s32[8,1], index: 3, kind: input, shape index: {}]   ;;  %s2116_s4 = inlined_call_operand.hbm [shape: f32[2,2,6], index: 4, kind: output, shape index: {}]  }
   0x1   :  { %11 = vsyncpa [#allocation8 + $0x1], 0 }
   0x2   :  { %12 = vsyncpa [#allocation11], 0 }
   0x3   :  { %14 = vsyncpa [#allocation11 + $0x1], 0 }
   0x4   :  { %15 = vsyncpa [#allocation9], 0 }
   0x5   :  { %17 = vsyncpa [#allocation9 + $0x1], 0  ;;  %s1493_s15 = smov 0   ;;  %s1495_s16 = smov 0  }
   0x6   :  { %s1497_s17 = smov 0   ;;  %s1499_s18 = smov 0  }
   0x7   :  { %s1501_s19 = smov 0   ;;  %s1503_s20 = smov 0  }
   0x8   :  { %s1505_s21 = smov 0   ;;  %s1507_s22 = smov 0  }
   0x9   :  { %s1509_s23 = smov 0   ;;  %s1511_s24 = smov 0  }
   0xa   :  { %s1513_s25 = smov 0  }
   0xb LB: > { %2125 = sst [smem:[#allocation16_spill]] %s1422_s17  ;;  %s1118_s26 = sadd.s32 4294967295, %s1454_s25   ;;  %s1454_s25 = sphi %s1513_s25, %s23_s25   ;;  %s1450_s24 = sphi %s1511_s24, %s2146_s24   ;;  %s1446_s23 = sphi %s1509_s23, %s2152_s23   ;;  %s1442_s22 = sphi %s1507_s22, %s2144_s22   ;;  %s1438_s21 = sphi %s1505_s21, %s2143_s21   ;;  %s1434_s20 = sphi %s1503_s20, %s2151_s20   ;;  %s1430_s19 = sphi %s1501_s19, %s2150_s19   ;;  %s1426_s18 = sphi %s1499_s18, %s2149_s18   ;;  %s1422_s17 = sphi %s1497_s17, %s2141_s17   ;;  %s1418_s16 = sphi %s1495_s16, %s2148_s16   ;;  %s1414_s15 = sphi %s1493_s15, %s2147_s15  }
   0xc   : > { %2126 = sst [smem:[#allocation17_spill]] %s1446_s23  ;;  %s1119_s27 = sadd.s32 4294967294, %s1454_s25  }
   0xd   : > { %2127 = sst [smem:[#allocation18_spill]] %s1450_s24  ;;  %s32_s28 = sadd.s32 1, %s1446_s23 }
   0xe   : > { %s35_s29 = sadd.s32 1, %s1450_s24  ;;  %p33_p0 = scmp.ge.s32.totalorder %s32_s28, 4 }
   0xf   : > { %s1120_s30 = sshll.u32 %s1450_s24, 2  ;;  %s50_s6 = sadd.s32 1, %s1434_s20 }
  0x10   : > { %s40_s5 = sadd.s32 %s1446_s23, %s1120_s30  ;;  %s2154_s28 = smov (%p33_p0, %s32_s28), 0 }
  0x11   : > { %2128 = sst [smem:[#allocation19_spill]] %s2154_s28  ;;  %s2156_s29 = smov (!%p33_p0, %s35_s29), %s1450_s24 }
  0x12   : > { %p41_p1 = scmp.lt.s32.totalorder %s40_s5, 6  ;;  %p57_p2 = scmp.ne.s32.totalorder %s1434_s20, %s1430_s19 }
  0x13   : > { %p37_p3 = scmp.ge.s32.totalorder %s2156_s29, 2  ;;  %p58_p4 = scmp.eq.s32.totalorder %s1454_s25, 0 }
  0x14   : > { %s2158_s5 = smov (!%p41_p1, %s40_s5), 6  ;;  %p63_p6 = scmp.ne.s32.totalorder %s1430_s19, %s1426_s18 }
  0x15   : > { %s2160_s29 = smov (%p37_p3, %s2156_s29), 0  ;;  %p1565_p5 = por %p58_p4, %p57_p2 }
  0x16   : > { %2129 = sst [smem:[#allocation20_spill]] %s2160_s29  ;;  %s1121_s8 = sshll.u32 %s2160_s29, 2 }
  0x17   : > { %s2130_s7 = scalar_select %p1565_p5, 1, 0 }
  0x18   : > { %p64_p7 = scmp.eq.s32.totalorder %s1118_s26, 0  ;;  %s44_s9 = sadd.s32 %s1121_s8, %s2154_s28 }
  0x19   : > { %s149_s10 = ssub.s32 %s1450_s24, %s2160_s29  ;;  %p45_p8 = scmp.lt.s32.totalorder %s44_s9, 6 }
  0x1a   : > { %p1577_p9 = por %p64_p7, %p63_p6  ;;  %p150_p10 = scmp.eq.s32.totalorder %s149_s10, 0 }
  0x1b   : > { %s152_s12 = sadd.s32 1, %s1422_s17  ;;  %s2162_s9 = smov (!%p45_p8, %s44_s9), 6 }
  0x1c   : > { %s2131_s11 = scalar_select %p1577_p9, 1, 0 }
  0x1d   : > { %s1583_s13 = scalar_select %p150_p10, %s1422_s17, %s152_s12  }
  0x1e   : > { %s47_s14 = ssub.s32 %s2158_s5, %s2162_s9  ;;  %p162_p11 = scmp.ne.s32.totalorder %s1422_s17, %s1418_s16 }
  0x1f   : > { %2132 = sst [smem:[#allocation21_spill]] %s1583_s13  ;;  %p48_p12 = scmp.eq.s32.totalorder %s47_s14, 0 }
  0x20   : > { %p163_p13 = scmp.eq.s32.totalorder %s1118_s26, 7  ;;  %p168_p0 = scmp.ne.s32.totalorder %s1418_s16, %s1414_s15 }
  0x21   : > { %p169_p1 = scmp.eq.s32.totalorder %s1119_s27, 7  ;;  %p1125_p4 = scmp.ge.s32.totalorder %s1454_s25, 8 }
  0x22   : > { %s1595_s18 = scalar_select %p48_p12, %s1434_s20, %s50_s6  }
  0x23   : > { %p1597_p2 = por %p163_p13, %p162_p11  ;;  %p1601_p3 = por %p169_p1, %p168_p0 }
  0x24   : > { %2133 = sst [smem:[#allocation22_spill]] %s1595_s18  ;;  %191 = sbr.rel (%p1125_p4) target bundleno = 113 (0x71), region = 24 }
  0x25   : > { %s2134_s30 = scalar_select %p1597_p2, 1, 0 }
  0x26   : > { %s2135_s8 = scalar_select %p1601_p3, 1, 0 }
  0x2b   : > { %194 = sbr.rel (!%p1565_p5) target bundleno = 77 (0x4d), region = 28  ;;  %s195_s26 = sand.u32 (%p1565_p5), 1, %s1434_s20  }
  0x2c   : > { %s1128_s27 = sshll.u32 (%p1565_p5), %s2158_s5, 3  ;;  %s1126_s6 = sshll.u32 (%p1565_p5), %s195_s26, 4 }
  0x2d   : > { %s205_s9 = ssub.s32 (%p1565_p5), 50, %s1128_s27  ;;  %s1613_s14 = scalar_lea.sflag (%p1565_p5), [#allocation8], %s195_s26 }
  0x2e   : > { %p206_p6 = scmp.lt.s32.totalorder (%p1565_p5), %s205_s9, 8  ;;  %s199_s29 = scalar_lea.vmem (%p1565_p5), [#allocation7], %s1126_s6 }
  0x32   : > { %s2164_s9 = smov (!%p206_p6, %s205_s9), 8 }
  0x33   : > { %s1610_s10 = sshll.u32 %s2164_s9, 5 }
  0x34   : > { %s210_s12 = ssub.s32 256, %s1610_s10 }
  0x35   : > { %211 = vsyncadd %s1613_s14, %s210_s12  ;;  %p1130_p7 = scmp.ne.s32.totalorder %s1610_s10, 0  ;;  %s1157_s28 = sshll.u32 %s2158_s5, 8 }
  0x36   : > { %s1621_s27 = scalar_lea.hbm %s2112_s0, %s1157_s28  ;;  %s217_s26 = sshll.u32 %s199_s29, 4  ;;  %s218_s26 = int_to_ptr.vmem [resolvable:$true] %s217_s26 }
  0x37   : > { %s1272_s9 = scalar_lea.hbm %s1621_s27, %s1610_s10  ;;  %s1276_s18 = scalar_lea.hbm %s2112_s0, 1600 }
  0x38   : > { %p1273_p8 = scmp.ne.s32.totalorder %s1621_s27, %s1272_s9  ;;  %p1277_p12 = scmp.lt.u32.totalorder %s1621_s27, %s2112_s0 }
  0x39   : > { %p1278_p13 = scmp.lt.u32.totalorder %s1276_s18, %s1272_s9  ;;  %p1280_p1 = scmp.lt.u32.totalorder %s1272_s9, %s1621_s27 }
  0x3a   : > { %p1274_p10 = pnand %p1273_p8, %p1130_p7 }
  0x3b   : > { %p1279_p0 = por %p1278_p13, %p1277_p12 }
  0x3c   : > { %p1275_p11 = pneg %p1274_p10 }
  0x3d   : > { %p1281_p4 = por %p1280_p1, %p1279_p0 }
  0x3f   : > { %p1282_p6 = pnand %p1281_p4, %p1275_p11 }
  0x41   : > { %1285 = shalt.err (!%p1282_p6)
}
  0x42   : > { %s1286_s23 = scalar_lea.vmem %s218_s26, %s1610_s10  ;;  %s1456_s24 = smov [#allocation7]  }
  0x43   : > { %p1287_p3 = scmp.ne.s32.totalorder %s218_s26, %s1286_s23  ;;  %s1290_s28 = sshll.u32 %s1456_s24, 4  ;;  %s1291_s28 = int_to_ptr.vmem [resolvable:$false] %s1290_s28 }
  0x44   : > { %s1292_s29 = scalar_lea.vmem %s1291_s28, 512  ;;  %p1293_p2 = scmp.lt.s32.totalorder %s218_s26, %s1291_s28 }
  0x45   : > { %p1288_p8 = pnand %p1287_p3, %p1130_p7  ;;  %p1294_p9 = scmp.lt.s32.totalorder %s1292_s29, %s1286_s23 }
  0x47   : > { %p1289_p10 = pneg %p1288_p8  ;;  %p1295_p5 = por %p1294_p9, %p1293_p2 }
  0x49   : > { %p1296_p12 = pnand %p1295_p5, %p1289_p10 }
  0x4b   : > { %1299 = shalt.err (!%p1296_p12)
}
  0x4c   : > { %220 = dma.hbm_to_vmem [thread:$0]  (%p1130_p7), %s1621_s27, %s1610_s10, %s218_s26, %s1613_s14  }
  0x4d PF: > { %p2136_p11 = scmp.ne.s32.totalorder %s2130_s7, 0 }
  0x4e   : > { %s224_s17 = sand.u32 (%p2136_p11), 1, %s1434_s20   ;;  %s1136_s13 = sshll.u32 (%p2136_p11), %s2158_s5, 3 }
  0x4f   : > { %223 = sbr.rel (!%p2136_p11) target bundleno = 113 (0x71), region = 32  ;;  %s1134_s18 = sshll.u32 (%p2136_p11), %s224_s17, 4 }
  0x50   : > { %s234_s9 = ssub.s32 (%p2136_p11), 49, %s1136_s13  ;;  %s1651_s23 = scalar_lea.sflag (%p2136_p11), [#allocation11], %s224_s17 }
  0x51   : > { %p235_p3 = scmp.lt.s32.totalorder (%p2136_p11), %s234_s9, 8  ;;  %s228_s10 = scalar_lea.vmem (%p2136_p11), [#allocation10], %s1134_s18 }
  0x56   : > { %s2166_s9 = smov (!%p235_p3, %s234_s9), 8 }
  0x57   : > { %s1648_s6 = sshll.u32 %s2166_s9, 5 }
  0x58   : > { %s239_s12 = ssub.s32 256, %s1648_s6 }
  0x59   : > { %240 = vsyncadd %s1651_s23, %s239_s12  ;;  %p1138_p5 = scmp.ne.s32.totalorder %s1648_s6, 0  ;;  %s1158_s7 = sshll.u32 %s2158_s5, 8 }
  0x5a   : > { %s1659_s26 = scalar_lea.hbm %s2113_s1, %s1158_s7  ;;  %s246_s24 = sshll.u32 %s228_s10, 4  ;;  %s247_s24 = int_to_ptr.vmem [resolvable:$true] %s246_s24 }
  0x5b   : > { %s1300_s28 = scalar_lea.hbm %s1659_s26, %s1648_s6  ;;  %s1304_s5 = scalar_lea.hbm %s2113_s1, 1568 }
  0x5c   : > { %p1301_p9 = scmp.ne.s32.totalorder %s1659_s26, %s1300_s28  ;;  %p1305_p13 = scmp.lt.u32.totalorder %s1659_s26, %s2113_s1 }
  0x5d   : > { %p1306_p0 = scmp.lt.u32.totalorder %s1304_s5, %s1300_s28  ;;  %p1308_p4 = scmp.lt.u32.totalorder %s1300_s28, %s1659_s26 }
  0x5e   : > { %p1302_p2 = pnand %p1301_p9, %p1138_p5 }
  0x5f   : > { %p1307_p1 = por %p1306_p0, %p1305_p13 }
  0x60   : > { %p1303_p7 = pneg %p1302_p2 }
  0x61   : > { %p1309_p6 = por %p1308_p4, %p1307_p1 }
  0x63   : > { %p1310_p8 = pnand %p1309_p6, %p1303_p7 }
  0x65   : > { %1313 = shalt.err (!%p1310_p8)
}
  0x66   : > { %s1314_s9 = scalar_lea.vmem %s247_s24, %s1648_s6  ;;  %s1457_s12 = smov [#allocation10]  }
  0x67   : > { %p1315_p10 = scmp.ne.s32.totalorder %s247_s24, %s1314_s9  ;;  %s1318_s10 = sshll.u32 %s1457_s12, 4  ;;  %s1319_s10 = int_to_ptr.vmem [resolvable:$false] %s1318_s10 }
  0x68   : > { %s1320_s7 = scalar_lea.vmem %s1319_s10, 512  ;;  %p1321_p3 = scmp.lt.s32.totalorder %s247_s24, %s1319_s10 }
  0x69   : > { %p1316_p12 = pnand %p1315_p10, %p1138_p5  ;;  %p1322_p9 = scmp.lt.s32.totalorder %s1320_s7, %s1314_s9 }
  0x6b   : > { %p1317_p11 = pneg %p1316_p12  ;;  %p1323_p2 = por %p1322_p9, %p1321_p3 }
  0x6d   : > { %p1324_p0 = pnand %p1323_p2, %p1317_p11 }
  0x6f   : > { %1327 = shalt.err (!%p1324_p0)
}
  0x70   : > { %249 = dma.hbm_to_vmem [thread:$0]  (%p1138_p5), %s1659_s26, %s1648_s6, %s247_s24, %s1651_s23  }
  0x71 PF: > { %p1142_p7 = scmp.ge.s32.totalorder %s1454_s25, 1  ;;  %p251_p13 = scmp.lt.s32.totalorder %s1454_s25, 9 }
  0x73   : > { %p252_p1 = pnand %p1142_p7, %p251_p13 }
  0x74   : > { %s257_s14 = sand.u32 (!%p252_p1), 1, %s1430_s19   ;;  %p2137_p4 = scmp.ne.s32.totalorder (!%p252_p1), %s2131_s11, 0 }
  0x75   : > { %255 = sbr.rel (%p252_p1) target bundleno = 1082 (0x43a), region = 36  ;;  %s1143_s27 = sshll.u32 (!%p252_p1), %s257_s14, 4 }
  0x76   : > { %s258_s28 = scalar_lea.sflag (!%p252_p1), [#allocation8], %s257_s14  ;;  %s261_s29 = scalar_lea.vmem (!%p252_p1), [#allocation7], %s1143_s27 }
  0x7c   : > { %1401 = dma.done.wait (%p2137_p4), %s258_s28, 256  }
  0x7d   : > { %1403 = vsyncadd (%p2137_p4), %s258_s28, 4294967040  ;;  %s267_s6 = scalar_lea.sflag [#allocation11], %s257_s14  ;;  %s270_s23 = scalar_lea.vmem [#allocation10], %s1143_s27 }
  0x7e   : > { %1405 = dma.done.wait (%p2137_p4), %s267_s6, 256  }
  0x7f   : > { %1407 = vsyncadd (%p2137_p4), %s267_s6, 4294967040  ;;  %s297_s26 = sand.u32 1, %s1418_s16   ;;  %p1146_p5 = scmp.ne.s32.totalorder %s1438_s21, 0 }
  0x80   : > { %s1696_s24 = sshll.u32 %s297_s26, 1  ;;  %vm322_vm0 = vcmask (!%p1146_p5), 1024   ;;  %v1458_v0 = vmov (!%p1146_p5), 0.0  }
  0x81   : > { %s299_s17 = scalar_lea.vmem [#allocation12], %s1696_s24  ;;  %321 = sbr.rel (%p1146_p5) target bundleno = 136 (0x88), region = 48  ;;  %323 = vst.msk [vmem:[#allocation2] sm:$0x3] (!%p1146_p5), %vm322_vm0, %v1458_v0  ;;  %324 = vst.msk [vmem:[#allocation3] sm:$0x3] (!%p1146_p5), %vm322_vm0, %v1458_v0 }
  0x82   : > { %325 = vst.msk [vmem:[#allocation4] sm:$0x3] (!%p1146_p5), %vm322_vm0, %v1458_v0  ;;  %326 = vst.msk [vmem:[#allocation5] sm:$0x3] (!%p1146_p5), %vm322_vm0, %v1458_v0 }
  0x83   : > { %327 = vst.msk [vmem:[#allocation6] sm:$0x3] (!%p1146_p5), %vm322_vm0, %v1458_v0 }
  0x88 PF: > { %v1700_v1 = vld [vmem:[%s261_s29] sm:$0xff]  ;;  %v1702_v2 = vld [vmem:[%s261_s29 + $0x8] sm:$0xff]  ;;  %s1147_s11 = sshll.u32 %s1442_s22, 2 }
  0x89   : > { %v1704_v3 = vld [vmem:[%s270_s23] sm:$0xff]  ;;  %v1707_v4 = vld [vmem:[%s270_s23 + $0x8] sm:$0xff]  ;;  %s1710_s5 = sadd.s32 %s1438_s21, %s1147_s11 }
  0x8a   : > { %s1148_s13 = sshll.u32 %s1710_s5, 10 }
  0x8b   : > { %s1715_s18 = sadd.s32 1024, %s1148_s13 }
  0x8c   : > { %p1149_p6 = scmp.gt.s32.totalorder %s1715_s18, 6272 }
  0x8d   : > { %v347_v5 = vlaneseq (!%p1149_p6)  ;;  %v1459_v6 = vmov (!%p1149_p6), 1983009808   ;;  %v471_v9 = vmul.f32 (!%p1149_p6), %v1700_v1, %v1700_v1  ;;  %v343_v10 = vcombine.high (!%p1149_p6), %v1700_v1, %v1700_v1 }
  0x8e   : > { %339 = sbr.rel (%p1149_p6) target bundleno = 332 (0x14c), region = 52  ;;  %v345_v7 = vunpack.c.l.s4 (!%p1149_p6), %v1459_v6  ;;  %v360_v12 = vcombine.high (!%p1149_p6), %v1702_v2, %v1702_v2  ;;  %v472_v13 = vmul.f32 (!%p1149_p6), %v1702_v2, %v1702_v2  ;;  %v1728_v15 = vmul.f32 (!%p1149_p6), %v1704_v3, %v1704_v3 }
  0x8f   : > { %v348_v8 = vshrl.u32 (!%p1149_p6), %v347_v5, 7  ;;  %v475_v14 = vcombine.high (!%p1149_p6), %v471_v9, %v471_v9  ;;  %vm385_vm1 = vcmask (!%p1149_p6), 1041408   ;;  %v409_v17 = vcombine.high (!%p1149_p6), %v1704_v3, %v1704_v3 }
  0x90   : > { %v346_v11 = vunpack.c.0.s8 (!%p1149_p6), %v345_v7  ;;  %v426_v18 = vcombine.high (!%p1149_p6), %v1707_v4, %v1707_v4  ;;  %v492_v19 = vcombine.high (!%p1149_p6), %v472_v13, %v472_v13  ;;  %v1738_v20 = vmul.f32 (!%p1149_p6), %v1707_v4, %v1707_v4 }
  0x91   : > { %v541_v21 = vcombine.high (!%p1149_p6), %v1728_v15, %v1728_v15  ;;  %v1744_v22 = vmul.f32 (!%p1149_p6), %v1704_v3, %v1700_v1  ;;  %v1757_v30 = vmul.f32 (!%p1149_p6), %v1707_v4, %v1702_v2  ;;  %vm404_vm2 = vcmask (!%p1149_p6), 1024  }
  0x92   : > { %v1730_v16 = vsub.s32 (!%p1149_p6), %v346_v11, %v348_v8  ;;  %v558_v37 = vcombine.high (!%p1149_p6), %v1738_v20, %v1738_v20 }
  0x93   : > { %v607_v38 = vcombine.high (!%p1149_p6), %v1744_v22, %v1744_v22 }
  0x94   : > { %v350_v23 = vrot.slane (!%p1149_p6), %v1700_v1, %v1730_v16  ;;  %v357_v24 = vrot.slane (!%p1149_p6), %v343_v10, %v1730_v16  ;;  %v367_v25 = vrot.slane (!%p1149_p6), %v1702_v2, %v1730_v16  ;;  %v374_v26 = vrot.slane (!%p1149_p6), %v360_v12, %v1730_v16 }
  0x95   : > { %v482_v27 = vrot.slane %v471_v9, %v1730_v16  ;;  %v489_v28 = vrot.slane %v475_v14, %v1730_v16  ;;  %v499_v29 = vrot.slane %v472_v13, %v1730_v16  ;;  %v506_v36 = vrot.slane %v492_v19, %v1730_v16 }
  0x96   : > { %v358_v31 = vcombine.high %v350_v23, %v350_v23  ;;  %v359_v32 = vcombine.high %v357_v24, %v357_v24  ;;  %v375_v33 = vcombine.high %v367_v25, %v367_v25  ;;  %v376_v34 = vcombine.high %v374_v26, %v374_v26 }
  0x97   : > { %v386_v35 = vsel %vm385_vm1, %v350_v23, 0.0  ;;  %v389_v40 = vsel %vm385_vm1, %v357_v24, 0.0  ;;  %v393_v41 = vsel %vm385_vm1, %v367_v25, 0.0  ;;  %v397_v42 = vsel %vm385_vm1, %v374_v26, 0.0 }
  0x98   : > { %v387_v39 = vsel %vm385_vm1, %v358_v31, 0.0  ;;  %v391_v44 = vsel %vm385_vm1, %v359_v32, 0.0  ;;  %v490_v45 = vcombine.high %v482_v27, %v482_v27  ;;  %v491_v46 = vcombine.high %v489_v28, %v489_v28 }
  0x99   : > { %v388_v43 = vadd.f32 %v387_v39, %v386_v35  ;;  %v395_v47 = vsel %vm385_vm1, %v375_v33, 0.0  ;;  %v399_v48 = vsel %vm385_vm1, %v376_v34, 0.0  ;;  %v507_v49 = vcombine.high %v499_v29, %v499_v29 }
  0x9a   : > { %v517_v50 = vsel %vm385_vm1, %v482_v27, 0.0  ;;  %v508_v52 = vcombine.high %v506_v36, %v506_v36  ;;  %v518_v53 = vsel %vm385_vm1, %v490_v45, 0.0  ;;  %v520_v54 = vsel %vm385_vm1, %v489_v28, 0.0 }
  0x9b   : > { %v390_v51 = vadd.f32 %v389_v40, %v388_v43  ;;  %v519_v55 = vadd.f32 %v518_v53, %v517_v50  ;;  %v522_v56 = vsel %vm385_vm1, %v491_v46, 0.0  ;;  %v524_v57 = vsel %vm385_vm1, %v499_v29, 0.0 }
  0x9c   : > { %v416_v58 = vrot.slane %v1704_v3, %v1730_v16  ;;  %v423_v60 = vrot.slane %v409_v17, %v1730_v16  ;;  %v433_v61 = vrot.slane %v1707_v4, %v1730_v16  ;;  %v440_v62 = vrot.slane %v426_v18, %v1730_v16 }
  0x9d   : > { %v392_v59 = vadd.f32 %v391_v44, %v390_v51  ;;  %v521_v63 = vadd.f32 %v520_v54, %v519_v55  ;;  %v526_v0 = vsel %vm385_vm1, %v507_v49, 0.0  ;;  %v528_v8 = vsel %vm385_vm1, %v506_v36, 0.0 }
  0x9e   : > { %v424_v5 = vcombine.high %v416_v58, %v416_v58  ;;  %v451_v6 = vsel %vm385_vm1, %v416_v58, 0.0  ;;  %v425_v9 = vcombine.high %v423_v60, %v423_v60  ;;  %v548_v10 = vrot.slane %v1728_v15, %v1730_v16 }
  0x9f   : > { %v394_v7 = vadd.f32 %v393_v41, %v392_v59  ;;  %v523_v11 = vadd.f32 %v522_v56, %v521_v63  ;;  %v441_v12 = vcombine.high %v433_v61, %v433_v61  ;;  %v454_v14 = vsel %vm385_vm1, %v423_v60, 0.0 }
  0xa0   : > { %v452_v13 = vsel %vm385_vm1, %v424_v5, 0.0  ;;  %v530_v18 = vsel %vm385_vm1, %v508_v52, 0.0  ;;  %v442_v19 = vcombine.high %v440_v62, %v440_v62  ;;  %v456_v25 = vsel %vm385_vm1, %v425_v9, 0.0 }
  0xa1   : > { %v396_v17 = vadd.f32 %v395_v47, %v394_v7  ;;  %v453_v23 = vadd.f32 %v452_v13, %v451_v6  ;;  %v525_v24 = vadd.f32 %v524_v57, %v523_v11  ;;  %v458_v26 = vsel %vm385_vm1, %v433_v61, 0.0 }
  0xa2   : > { %v555_v27 = vrot.slane %v541_v21, %v1730_v16  ;;  %v556_v29 = vcombine.high %v548_v10, %v548_v10  ;;  %v565_v31 = vrot.slane %v1738_v20, %v1730_v16  ;;  %v460_v33 = vsel %vm385_vm1, %v441_v12, 0.0 }
  0xa3   : > { %v398_v28 = vadd.f32 %v397_v42, %v396_v17  ;;  %v455_v15 = vadd.f32 %v454_v14, %v453_v23  ;;  %v527_v32 = vadd.f32 %v526_v0, %v525_v24  ;;  %v583_v35 = vsel %vm385_vm1, %v548_v10, 0.0 }
  0xa4   : > { %v557_v34 = vcombine.high %v555_v27, %v555_v27  ;;  %v572_v40 = vrot.slane %v558_v37, %v1730_v16  ;;  %v584_v41 = vsel %vm385_vm1, %v556_v29, 0.0  ;;  %v573_v21 = vcombine.high %v565_v31, %v565_v31  ;;  %v470_v29 = vld [vmem:[#allocation4] sm:$0x3] }
  0xa5   : > { %v400_v36 = vadd.f32 %v399_v48, %v398_v28  ;;  %v457_v39 = vadd.f32 %v456_v25, %v455_v15  ;;  %v529_v43 = vadd.f32 %v528_v8, %v527_v32  ;;  %v585_v42 = vadd.f32 %v584_v41, %v583_v35  ;;  %v602_v41 = vld [vmem:[#allocation6] sm:$0x3] }
  0xa6   : > { %v586_v44 = vsel %vm385_vm1, %v555_v27, 0.0  ;;  %v588_v20 = vsel %vm385_vm1, %v557_v34, 0.0  ;;  %v462_v47 = vsel %vm385_vm1, %v440_v62, 0.0  ;;  %v624_v48 = vcombine.high %v1757_v30, %v1757_v30  ;;  %v340_v27 = vld [vmem:[#allocation2] sm:$0x3] }
  0xa7   : > { %401 = vadd.xlane.f32.xlu0 %v400_v36  ;;  %v459_v45 = vadd.f32 %v458_v26, %v457_v39  ;;  %v531_v46 = vadd.f32 %v530_v18, %v529_v43  ;;  %v587_v49 = vadd.f32 %v586_v44, %v585_v42  ;;  %v590_v37 = vsel %vm385_vm1, %v565_v31, 0.0  ;;  %v536_v36 = vld [vmem:[#allocation5] sm:$0x3] }
  0xa8   : > { %v614_v51 = vrot.slane %v1744_v22, %v1730_v16  ;;  %v621_v52 = vrot.slane %v607_v38, %v1730_v16  ;;  %v464_v53 = vsel %vm385_vm1, %v442_v19, 0.0  ;;  %v574_v54 = vcombine.high %v572_v40, %v572_v40 }
  0xa9   : > { %v461_v50 = vadd.f32 %v460_v33, %v459_v45  ;;  %532 = vadd.xlane.f32.xlu1 %v531_v46  ;;  %v589_v55 = vadd.f32 %v588_v20, %v587_v49  ;;  %v592_v56 = vsel %vm385_vm1, %v573_v21, 0.0  ;;  %v631_v60 = vrot.slane %v1757_v30, %v1730_v16  ;;  %v406_v33 = vld [vmem:[#allocation3] sm:$0x3] }
  0xaa   : > { %v622_v58 = vcombine.high %v614_v51, %v614_v51  ;;  %v623_v59 = vcombine.high %v621_v52, %v621_v52  ;;  %v649_v62 = vsel %vm385_vm1, %v614_v51, 0.0  ;;  %v594_v22 = vsel %vm385_vm1, %v572_v40, 0.0 }
  0xab   : > { %v463_v57 = vadd.f32 %v462_v47, %v461_v50  ;;  %v591_v61 = vadd.f32 %v590_v37, %v589_v55  ;;  %v652_v0 = vsel %vm385_vm1, %v621_v52, 0.0  ;;  %v596_v7 = vsel %vm385_vm1, %v574_v54, 0.0 }
  0xac   : > { %v650_v38 = vsel %vm385_vm1, %v622_v58, 0.0  ;;  %v638_v8 = vrot.slane %v624_v48, %v1730_v16  ;;  %v639_v9 = vcombine.high %v631_v60, %v631_v60  ;;  %v654_v30 = vsel %vm385_vm1, %v623_v59, 0.0 }
  0xad   : > { %v465_v63 = vadd.f32 %v464_v53, %v463_v57  ;;  %v593_v5 = vadd.f32 %v592_v56, %v591_v61  ;;  %v651_v6 = vadd.f32 %v650_v38, %v649_v62  ;;  %v656_v12 = vsel %vm385_vm1, %v631_v60, 0.0 }
  0xae   : > { %v640_v17 = vcombine.high %v638_v8, %v638_v8  ;;  %v658_v18 = vsel %vm385_vm1, %v639_v9, 0.0  ;;  %v660_v23 = vsel %vm385_vm1, %v638_v8, 0.0 }
  0xaf   : > { %466 = vadd.xlane.f32.xlu0 %v465_v63  ;;  %v595_v10 = vadd.f32 %v594_v22, %v593_v5  ;;  %v653_v11 = vadd.f32 %v652_v0, %v651_v6 }
  0xb0   : > { %v662_v25 = vsel %vm385_vm1, %v640_v17, 0.0 }
  0xb1   : > { %v597_v13 = vadd.f32 %v596_v7, %v595_v10  ;;  %v655_v14 = vadd.f32 %v654_v30, %v653_v11 }
  0xb3   : > { %598 = vadd.xlane.f32.xlu1 %v597_v13  ;;  %v657_v19 = vadd.f32 %v656_v12, %v655_v14 }
  0xb5   : > { %v659_v24 = vadd.f32 %v658_v18, %v657_v19 }
  0xb7   : > { %v661_v16 = vadd.f32 %v660_v23, %v659_v24 }
  0xb9   : > { %v663_v26 = vadd.f32 %v662_v25, %v661_v16 }
  0xbb   : > { %664 = vadd.xlane.f32.xlu0 %v663_v26 }
 0x134   : > { %v402_v28 = vpop.xlane.xlu0 %401 }
 0x135   : > { %v403_v15 = vadd.f32 %v402_v28, %v340_v27 }
 0x136   : > { %v533_v31 = vpop.xlane.xlu1 %532 }
 0x137   : > { %405 = vst.msk [vmem:[#allocation2] sm:$0x3] %vm404_vm2, %v403_v15  ;;  %v534_v32 = vadd.f32 %v533_v31, %v470_v29 }
 0x139   : > { %535 = vst.msk [vmem:[#allocation4] sm:$0x3] %vm404_vm2, %v534_v32 }
 0x13c   : > { %v467_v34 = vpop.xlane.xlu0 %466 }
 0x13d   : > { %v468_v35 = vadd.f32 %v467_v34, %v406_v33 }
 0x13f   : > { %469 = vst.msk [vmem:[#allocation3] sm:$0x3] %vm404_vm2, %v468_v35 }
 0x140   : > { %v599_v39 = vpop.xlane.xlu1 %598 }
 0x141   : > { %v600_v40 = vadd.f32 %v599_v39, %v536_v36 }
 0x143   : > { %601 = vst.msk [vmem:[#allocation5] sm:$0x3] %vm404_vm2, %v600_v40 }
 0x148   : > { %v665_v43 = vpop.xlane.xlu0 %664 }
 0x149   : > { %v666_v21 = vadd.f32 %v665_v43, %v602_v41 }
 0x14b   : > { %667 = vst.msk [vmem:[#allocation6] sm:$0x3] %vm404_vm2, %v666_v21 }
 0x14c PF: > { %p1150_p8 = scmp.le.s32.totalorder %s1715_s18, 6272 }
 0x14d   : > { %v672_v42 = vlaneseq (!%p1150_p8)  ;;  %v1460_v44 = vmov (!%p1150_p8), 1983009808   ;;  %s681_s9 = ssub.s32 (!%p1150_p8), 6272, %s1148_s13  ;;  %v693_v50 = vcombine.high (!%p1150_p8), %v1700_v1, %v1700_v1  ;;  %v710_v37 = vcombine.high (!%p1150_p8), %v1702_v2, %v1702_v2 }
 0x14e   : > { %671 = sbr.rel (%p1150_p8) target bundleno = 527 (0x20f), region = 56  ;;  %v695_v45 = vunpack.c.l.s4 (!%p1150_p8), %v1460_v44  ;;  %v1840_v48 = vstv (!%p1150_p8), %s681_s9  ;;  %vm796_vm3 = vcmask (!%p1150_p8), 1041408   ;;  %v745_v57 = vcombine.high (!%p1150_p8), %v1704_v3, %v1704_v3 }
 0x14f   : > { %v1833_v20 = vand.u32 (!%p1150_p8), 127, %v672_v42  ;;  %v698_v47 = vshrl.u32 (!%p1150_p8), %v672_v42, 7  ;;  %v762_v59 = vcombine.high (!%p1150_p8), %v1707_v4, %v1707_v4  ;;  %vm815_vm12 = vcmask (!%p1150_p8), 1024  }
 0x150   : > { %v696_v46 = vunpack.c.0.s8 (!%p1150_p8), %v695_v45 }
 0x151   : > { %v1838_v49 = vadd.s32 (!%p1150_p8), 256, %v1833_v20  ;;  %v1847_v51 = vadd.s32 (!%p1150_p8), 128, %v1833_v20  ;;  %v1850_v52 = vadd.s32 (!%p1150_p8), 384, %v1833_v20  ;;  %v1853_v53 = vadd.s32 (!%p1150_p8), 512, %v1833_v20 }
 0x152   : > { %v1856_v54 = vadd.s32 (!%p1150_p8), 640, %v1833_v20  ;;  %v1859_v55 = vadd.s32 (!%p1150_p8), 768, %v1833_v20  ;;  %v699_v56 = vsub.s32 (!%p1150_p8), %v696_v46, %v698_v47  ;;  %v1864_v58 = vadd.s32 (!%p1150_p8), 896, %v1833_v20 }
 0x153   : > { %vm683_vm4 = vcmp.lt.s32.totalorder (!%p1150_p8), %v1833_v20, %v1840_v48  ;;  %vm685_vm5 = vcmp.lt.s32.totalorder (!%p1150_p8), %v1838_v49, %v1840_v48  ;;  %vm684_vm6 = vcmp.lt.s32.totalorder (!%p1150_p8), %v1847_v51, %v1840_v48  ;;  %vm686_vm7 = vcmp.lt.s32.totalorder (!%p1150_p8), %v1850_v52, %v1840_v48 }
 0x154   : > { %v700_v60 = vrot.slane (!%p1150_p8), %v1700_v1, %v699_v56  ;;  %v707_v61 = vrot.slane (!%p1150_p8), %v693_v50, %v699_v56  ;;  %v717_v62 = vrot.slane (!%p1150_p8), %v1702_v2, %v699_v56  ;;  %v724_v63 = vrot.slane (!%p1150_p8), %v710_v37, %v699_v56 }
 0x155   : > { %vm687_vm8 = vcmp.lt.s32.totalorder %v1853_v53, %v1840_v48  ;;  %vm688_vm9 = vcmp.lt.s32.totalorder %v1856_v54, %v1840_v48  ;;  %vm689_vm10 = vcmp.lt.s32.totalorder %v1859_v55, %v1840_v48  ;;  %vm690_vm11 = vcmp.lt.s32.totalorder %v1864_v58, %v1840_v48 }
 0x156   : > { %v708_v1 = vcombine.high %v700_v60, %v700_v60  ;;  %v709_v22 = vcombine.high %v707_v61, %v707_v61  ;;  %v725_v38 = vcombine.high %v717_v62, %v717_v62  ;;  %v1889_v2 = vsel %vm683_vm4, %v700_v60, 0.0 }
 0x157   : > { %v1894_v0 = vsel %vm685_vm5, %v707_v61, 0.0  ;;  %v752_v5 = vrot.slane %v1704_v3, %v699_v56  ;;  %v726_v6 = vcombine.high %v724_v63, %v724_v63  ;;  %v759_v9 = vrot.slane %v745_v57, %v699_v56 }
 0x158   : > { %v1900_v7 = vsel %vm684_vm6, %v708_v1, 0.0  ;;  %v1905_v8 = vsel %vm686_vm7, %v709_v22, 0.0  ;;  %v797_v30 = vsel %vm796_vm3, %v1889_v2, 0.0  ;;  %v800_v3 = vsel %vm796_vm3, %v1894_v0, 0.0 }
 0x159   : > { %v798_v10 = vsel %vm796_vm3, %v1900_v7, 0.0  ;;  %v769_v11 = vrot.slane %v1707_v4, %v699_v56  ;;  %v1917_v12 = vsel %vm687_vm8, %v717_v62, 0.0  ;;  %v1922_v13 = vsel %vm688_vm9, %v725_v38, 0.0 }
 0x15a   : > { %v799_v14 = vadd.f32 %v798_v10, %v797_v30  ;;  %v1924_v17 = vrot.slane %v762_v59, %v699_v56  ;;  %v802_v18 = vsel %vm796_vm3, %v1905_v8, 0.0  ;;  %v838_v19 = vmul.f32 %v1889_v2, %v1889_v2 }
 0x15b   : > { %v839_v4 = vmul.f32 %v1900_v7, %v1900_v7  ;;  %v840_v23 = vmul.f32 %v1894_v0, %v1894_v0  ;;  %v1937_v24 = vsel %vm689_vm10, %v724_v63, 0.0  ;;  %v1942_v25 = vsel %vm690_vm11, %v726_v6, 0.0 }
 0x15c   : > { %v801_v16 = vadd.f32 %v800_v3, %v799_v14  ;;  %v841_v26 = vmul.f32 %v1905_v8, %v1905_v8  ;;  %v804_v27 = vsel %vm796_vm3, %v1917_v12, 0.0  ;;  %v842_v28 = vmul.f32 %v1917_v12, %v1917_v12 }
 0x15d   : > { %v846_v15 = vsel %vm796_vm3, %v838_v19, 0.0  ;;  %v847_v29 = vsel %vm796_vm3, %v839_v4, 0.0  ;;  %v806_v32 = vsel %vm796_vm3, %v1922_v13, 0.0  ;;  %v849_v34 = vsel %vm796_vm3, %v840_v23, 0.0 }
 0x15e   : > { %v803_v31 = vadd.f32 %v802_v18, %v801_v16  ;;  %v848_v33 = vadd.f32 %v847_v29, %v846_v15  ;;  %v808_v35 = vsel %vm796_vm3, %v1937_v24, 0.0  ;;  %v843_v36 = vmul.f32 %v1922_v13, %v1922_v13 }
 0x15f   : > { %v844_v39 = vmul.f32 %v1937_v24, %v1937_v24  ;;  %v851_v40 = vsel %vm796_vm3, %v841_v26, 0.0  ;;  %v760_v21 = vcombine.high %v752_v5, %v752_v5  ;;  %v761_v42 = vcombine.high %v759_v9, %v759_v9 }
 0x160   : > { %v805_v41 = vadd.f32 %v804_v27, %v803_v31  ;;  %v850_v43 = vadd.f32 %v849_v34, %v848_v33  ;;  %v845_v44 = vmul.f32 %v1942_v25, %v1942_v25  ;;  %v853_v45 = vsel %vm796_vm3, %v842_v28, 0.0 }
 0x161   : > { %v777_v46 = vcombine.high %v769_v11, %v769_v11  ;;  %v787_v47 = vsel %vm683_vm4, %v752_v5, 0.0  ;;  %v788_v56 = vsel %vm684_vm6, %v760_v21, 0.0  ;;  %v789_v57 = vsel %vm685_vm5, %v759_v9, 0.0 }
 0x162   : > { %v807_v50 = vadd.f32 %v806_v32, %v805_v41  ;;  %v852_v37 = vadd.f32 %v851_v40, %v850_v43  ;;  %v810_v59 = vsel %vm796_vm3, %v1942_v25, 0.0  ;;  %v855_v60 = vsel %vm796_vm3, %v843_v36, 0.0 }
 0x163   : > { %v857_v61 = vsel %vm796_vm3, %v844_v39, 0.0  ;;  %v790_v20 = vsel %vm686_vm7, %v761_v42, 0.0  ;;  %v818_v51 = vsel %vm796_vm3, %v787_v47, 0.0  ;;  %v819_v1 = vsel %vm796_vm3, %v788_v56, 0.0 }
 0x164   : > { %v809_v62 = vadd.f32 %v808_v35, %v807_v50  ;;  %v854_v63 = vadd.f32 %v853_v45, %v852_v37  ;;  %v859_v49 = vsel %vm796_vm3, %v845_v44, 0.0  ;;  %v791_v22 = vsel %vm687_vm8, %v769_v11, 0.0 }
 0x165   : > { %v820_v38 = vadd.f32 %v819_v1, %v818_v51  ;;  %v821_v5 = vsel %vm796_vm3, %v789_v57, 0.0  ;;  %v792_v52 = vsel %vm688_vm9, %v777_v46, 0.0  ;;  %v823_v30 = vsel %vm796_vm3, %v790_v20, 0.0 }
 0x166   : > { %v811_v6 = vadd.f32 %v810_v59, %v809_v62  ;;  %v856_v9 = vadd.f32 %v855_v60, %v854_v63  ;;  %v778_v10 = vcombine.high %v1924_v17, %v1924_v17  ;;  %v866_v14 = vmul.f32 %v787_v47, %v787_v47 }
 0x167   : > { %v822_v3 = vadd.f32 %v821_v5, %v820_v38  ;;  %v867_v18 = vmul.f32 %v788_v56, %v788_v56  ;;  %v825_v11 = vsel %vm796_vm3, %v791_v22, 0.0  ;;  %v868_v19 = vmul.f32 %v789_v57, %v789_v57 }
 0x168   : > { %812 = vadd.xlane.f32.xlu0 %v811_v6  ;;  %v858_v53 = vadd.f32 %v857_v61, %v856_v9  ;;  %v869_v4 = vmul.f32 %v790_v20, %v790_v20  ;;  %v793_v54 = vsel %vm689_vm10, %v1924_v17, 0.0  ;;  %v827_v16 = vsel %vm796_vm3, %v792_v52, 0.0 }
 0x169   : > { %v824_v23 = vadd.f32 %v823_v30, %v822_v3  ;;  %v870_v26 = vmul.f32 %v791_v22, %v791_v22  ;;  %v874_v28 = vsel %vm796_vm3, %v866_v14, 0.0  ;;  %v875_v15 = vsel %vm796_vm3, %v867_v18, 0.0  ;;  %v837_v3 = vld [vmem:[#allocation4] sm:$0x3]  ;;  %v817_v18 = vld [vmem:[#allocation3] sm:$0x3] }
 0x16a   : > { %v860_v27 = vadd.f32 %v859_v49, %v858_v53  ;;  %v877_v29 = vsel %vm796_vm3, %v868_v19, 0.0  ;;  %v794_v31 = vsel %vm690_vm11, %v778_v10, 0.0  ;;  %v876_v33 = vadd.f32 %v875_v15, %v874_v28  ;;  %v865_v19 = vld [vmem:[#allocation5] sm:$0x3] }
 0x16b   : > { %v826_v32 = vadd.f32 %v825_v11, %v824_v23  ;;  %v829_v55 = vsel %vm796_vm3, %v793_v54, 0.0  ;;  %v871_v17 = vmul.f32 %v792_v52, %v792_v52  ;;  %v879_v34 = vsel %vm796_vm3, %v869_v4, 0.0  ;;  %v893_v23 = vld [vmem:[#allocation6] sm:$0x3] }
 0x16c   : > { %861 = vadd.xlane.f32.xlu1 %v860_v27  ;;  %v894_v35 = vmul.f32 %v787_v47, %v1889_v2  ;;  %v878_v39 = vadd.f32 %v877_v29, %v876_v33  ;;  %v895_v40 = vmul.f32 %v788_v56, %v1900_v7  ;;  %v896_v41 = vmul.f32 %v789_v57, %v1894_v0 }
 0x16d   : > { %v828_v36 = vadd.f32 %v827_v16, %v826_v32  ;;  %v831_v43 = vsel %vm796_vm3, %v794_v31, 0.0  ;;  %v872_v48 = vmul.f32 %v793_v54, %v793_v54  ;;  %v881_v58 = vsel %vm796_vm3, %v870_v26, 0.0 }
 0x16e   : > { %v897_v21 = vmul.f32 %v790_v20, %v1905_v8  ;;  %v873_v44 = vmul.f32 %v794_v31, %v794_v31  ;;  %v880_v45 = vadd.f32 %v879_v34, %v878_v39  ;;  %v902_v46 = vsel %vm796_vm3, %v894_v35, 0.0 }
 0x16f   : > { %v830_v42 = vadd.f32 %v829_v55, %v828_v36  ;;  %v883_v2 = vsel %vm796_vm3, %v871_v17, 0.0  ;;  %v898_v47 = vmul.f32 %v791_v22, %v1917_v12  ;;  %v903_v7 = vsel %vm796_vm3, %v895_v40, 0.0 }
 0x170   : > { %v905_v0 = vsel %vm796_vm3, %v896_v41, 0.0  ;;  %v882_v37 = vadd.f32 %v881_v58, %v880_v45  ;;  %v904_v56 = vadd.f32 %v903_v7, %v902_v46  ;;  %v885_v57 = vsel %vm796_vm3, %v872_v48, 0.0 }
 0x171   : > { %v832_v50 = vadd.f32 %v831_v43, %v830_v42  ;;  %v899_v8 = vmul.f32 %v792_v52, %v1922_v13  ;;  %v907_v59 = vsel %vm796_vm3, %v897_v21, 0.0  ;;  %v887_v20 = vsel %vm796_vm3, %v873_v44, 0.0 }
 0x172   : > { %v884_v60 = vadd.f32 %v883_v2, %v882_v37  ;;  %v906_v61 = vadd.f32 %v905_v0, %v904_v56  ;;  %v900_v12 = vmul.f32 %v793_v54, %v1937_v24  ;;  %v909_v62 = vsel %vm796_vm3, %v898_v47, 0.0  ;;  %v795_v24 = vld [vmem:[#allocation2] sm:$0x3] }
 0x173   : > { %833 = vadd.xlane.f32.xlu0 %v832_v50  ;;  %v901_v1 = vmul.f32 %v794_v31, %v1942_v25  ;;  %v911_v49 = vsel %vm796_vm3, %v899_v8, 0.0 }
 0x174   : > { %v886_v63 = vadd.f32 %v885_v57, %v884_v60  ;;  %v908_v51 = vadd.f32 %v907_v59, %v906_v61  ;;  %v913_v13 = vsel %vm796_vm3, %v900_v12, 0.0 }
 0x175   : > { %v915_v6 = vsel %vm796_vm3, %v901_v1, 0.0 }
 0x176   : > { %v888_v22 = vadd.f32 %v887_v20, %v886_v63  ;;  %v910_v38 = vadd.f32 %v909_v62, %v908_v51 }
 0x178   : > { %889 = vadd.xlane.f32.xlu1 %v888_v22  ;;  %v912_v5 = vadd.f32 %v911_v49, %v910_v38 }
 0x17a   : > { %v914_v9 = vadd.f32 %v913_v13, %v912_v5 }
 0x17c   : > { %v916_v52 = vadd.f32 %v915_v6, %v914_v9 }
 0x17e   : > { %917 = vadd.xlane.f32.xlu0 %v916_v52 }
 0x1f5   : > { %v813_v30 = vpop.xlane.xlu0 %812 }
 0x1f6   : > { %v814_v10 = vadd.f32 %v813_v30, %v795_v24 }
 0x1f8   : > { %816 = vst.msk [vmem:[#allocation2] sm:$0x3] %vm815_vm12, %v814_v10 }
 0x1f9   : > { %v862_v25 = vpop.xlane.xlu1 %861 }
 0x1fa   : > { %v863_v14 = vadd.f32 %v862_v25, %v837_v3 }
 0x1fc   : > { %864 = vst.msk [vmem:[#allocation4] sm:$0x3] %vm815_vm12, %v863_v14 }
 0x200   : > { %v834_v53 = vpop.xlane.xlu0 %833 }
 0x201   : > { %v835_v11 = vadd.f32 %v834_v53, %v817_v18 }
 0x203   : > { %836 = vst.msk [vmem:[#allocation3] sm:$0x3] %vm815_vm12, %v835_v11 }
 0x205   : > { %v890_v4 = vpop.xlane.xlu1 %889 }
 0x206   : > { %v891_v54 = vadd.f32 %v890_v4, %v865_v19 }
 0x208   : > { %892 = vst.msk [vmem:[#allocation5] sm:$0x3] %vm815_vm12, %v891_v54 }
 0x20b   : > { %v918_v16 = vpop.xlane.xlu0 %917 }
 0x20c   : > { %v919_v26 = vadd.f32 %v918_v16, %v893_v23 }
 0x20e   : > { %920 = vst.msk [vmem:[#allocation6] sm:$0x3] %vm815_vm12, %v919_v26 }
 0x20f PF: > { %p1151_p10 = scmp.ne.s32.totalorder %s1438_s21, 3 }
 0x210   : > { %v925_v27 = vld [vmem:[%s2114_s2] sm:$0xff] (!%p1151_p10)  ;;  %vm935_vm13 = vcmask (!%p1151_p10), 130048   ;;  %v1461_v15 = vmov (!%p1151_p10), 0   ;;  %v927_v33 = vlaneseq (!%p1151_p10)  ;;  %v1462_v35 = vmov (!%p1151_p10), 0.0   ;;  %s1463_s21 = smov (!%p1151_p10), 1   ;;  %s1464_s27 = smov (!%p1151_p10), 2  }
 0x211   : > { %924 = sbr.rel (%p1151_p10) target bundleno = 1057 (0x421), region = 60  ;;  %v936_v28 = vsel (!%p1151_p10), %vm935_vm13, %v925_v27, -inf  ;;  %1267 = vset.pattern.permute.xlu0 (!%p1151_p10), %v1461_v15  ;;  %v926_v29 = vld [vmem:[%s2115_s3] sm:$0xff] (!%p1151_p10)  ;;  %vm953_vm15 = vcmask (!%p1151_p10), 7168   ;;  %s1465_s28 = smov (!%p1151_p10), 3   ;;  %vm990_vm0 = vcmask (!%p1151_p10), 15360  }
 0x212   : > { %937 = vmax.xlane.f32.xlu0 (!%p1151_p10), %v936_v28  ;;  %v928_v17 = vand.u32 (!%p1151_p10), 127, %v927_v33  ;;  %v969_v2 = vld [vmem:[#allocation3] sm:$0x3] (!%p1151_p10)  ;;  %v970_v47 = vld [vmem:[#allocation4] sm:$0x3] (!%p1151_p10)  ;;  %s1466_s29 = smov (!%p1151_p10), 4  }
 0x213   : > { %v971_v7 = vld [vmem:[#allocation5] sm:$0x3] (!%p1151_p10)  ;;  %v968_v12 = vld [vmem:[#allocation2] sm:$0x3] (!%p1151_p10)  ;;  %vm992_vm1 = vcmask (!%p1151_p10), 23552   ;;  %vm994_vm2 = vcmask (!%p1151_p10), 31744  }
 0x214   : > { %vm996_vm3 = vcmask (!%p1151_p10), 39936   ;;  %vm998_vm4 = vcmask (!%p1151_p10), 41984  }
 0x215   : > { %v972_v0 = vld [vmem:[#allocation6] sm:$0x3] (!%p1151_p10) }
 0x228   : > { %930 = vperm.xlu0 %1267, %v926_v29  }
 0x29f   : > { %v938_v31 = vpop.xlane.xlu0 %937 }
 0x2a0   : > { %v939_v32 = vsub.f32 %v925_v27, %v938_v31 }
 0x2a2   : > { %v940_v55 = vmul.f32 1.442695, %v939_v32 }
 0x2a4   : > { %1268 = vpow2.f32 %v940_v55 }
 0x2a7   : > { %v931_v34 = vpop.permute.xlu0 %930 }
 0x2a8   : > { %vm932_vm14 = vcmp.eq.s32.totalorder %v928_v17, %v931_v34 }
 0x2a9   : > { %v1152_v36 = vsel %vm932_vm14, 1.0, %v1462_v35 }
 0x2aa   : > { %v948_v39 = vmul.f32 %v1152_v36, %v925_v27 }
 0x2ac   : > { %v949_v43 = vsel %vm935_vm13, %v948_v39, 0.0 }
 0x2ae   : > { %v1269_v40 = vpop.eup %1268 }
 0x2af   : > { %v942_v41 = vsel %vm935_vm13, %v1269_v40, 0.0 }
 0x2b0   : > { %943 = vadd.xlane.f32.xlu1 %v942_v41 }
 0x2b4   : > { %950 = vadd.xlane.f32.xlu1 %v949_v43 }
 0x33d   : > { %v944_v48 = vpop.xlane.xlu1 %943 }
 0x33e   : > { %1270 = vlog2.f32 %v944_v48 }
 0x341   : > { %v951_v42 = vpop.xlane.xlu1 %950 }
 0x348   : > { %v1271_v58 = vpop.eup %1270 }
 0x349   : > { %v946_v21 = vmul.f32 0.6931472, %v1271_v58 }
 0x34b   : > { %v947_v44 = vadd.f32 %v946_v21, %v938_v31 }
 0x34d   : > { %v952_v45 = vsub.f32 %v947_v44, %v951_v42 }
 0x34f   : > { %v954_v46 = vsel %vm953_vm15, %v952_v45, 0.0 }
 0x350   : > { %955 = vadd.xlane.f32.xlu1 %v954_v46 }
 0x361   : > { %974 = vrot.lane.b32.xlu1 %v969_v2, %s1463_s21 }
 0x365   : > { %978 = vrot.lane.b32.xlu1 %v970_v47, %s1464_s27 }
 0x369   : > { %982 = vrot.lane.b32.xlu1 %v971_v7, %s1465_s28 }
 0x36d   : > { %986 = vrot.lane.b32.xlu1 %v972_v0, %s1466_s29 }
 0x3dd   : > { %v956_v50 = vpop.xlane.xlu1 %955 }
 0x3de   : > { %v957_v37 = vrot.slane %v956_v50, 4 }
 0x3e0   : > { %v958_v56 = vadd.f32 %v957_v37, %v956_v50 }
 0x3e1   : > { %v975_v61 = vpop.permute.xlu1 %974 }
 0x3e2   : > { %v959_v57 = vrot.slane %v958_v56, 2  ;;  %v989_v62 = vsel %vm953_vm15, %v968_v12, %v975_v61 }
 0x3e4   : > { %v960_v8 = vadd.f32 %v959_v57, %v958_v56 }
 0x3e5   : > { %v979_v20 = vpop.permute.xlu1 %978 }
 0x3e6   : > { %v961_v59 = vrot.slane %v960_v8, 1  ;;  %v991_v51 = vsel %vm990_vm0, %v989_v62, %v979_v20 }
 0x3e8   : > { %v962_v60 = vadd.f32 %v961_v59, %v960_v8 }
 0x3e9   : > { %v983_v63 = vpop.permute.xlu1 %982 }
 0x3ea   : > { %1159 = vpush %v962_v60  ;;  %v993_v1 = vsel %vm992_vm1, %v991_v51, %v983_v63 }
 0x3ed   : > { %v987_v49 = vpop.permute.xlu1 %986 }
 0x3ee   : > { %v995_v22 = vsel %vm994_vm2, %v993_v1, %v987_v49 }
 0x41b   : > { %s1160_s6 = spop %1159 }
 0x41c   : > { %s966_s23 = smul.f32 0.5, %s1160_s6 }
 0x41e   : > { %v967_v38 = vstv %s966_s23 }
 0x41f   : > { %v997_v13 = vsel %vm996_vm3, %v995_v22, %v967_v38 }
 0x420   : > { %999 = vst.msk [vmem:[%s299_s17] sm:$0x3] %vm998_vm4, %v997_v13 }
 0x421 PF: > { %s1154_s11 = sshll.u32 %s1442_s22, 5  ;;  %s1014_s9 = sshll.u32 %s299_s17, 4  ;;  %s1015_s9 = int_to_ptr.vmem [resolvable:$true] %s1014_s9 }
 0x422   : > { %s2052_s18 = scalar_lea.hbm %s2116_s4, %s1154_s11  ;;  %s1001_s12 = scalar_lea.sflag [#allocation9], %s297_s26 }
 0x423   : > { %s1328_s10 = scalar_lea.vmem %s1015_s9, 32  ;;  %p2138_p11 = scmp.ne.s32.totalorder %s2134_s30, 0 }
 0x424   : > { %p1329_p12 = scmp.ne.s32.totalorder %s1015_s9, %s1328_s10  ;;  %s1467_s7 = smov [#allocation12]  }
 0x425   : > { %s1332_s14 = sshll.u32 %s1467_s7, 4  ;;  %s1333_s14 = int_to_ptr.vmem [resolvable:$false] %s1332_s14 }
 0x426   : > { %p1330_p3 = pnand %p1329_p12, %p2138_p11  ;;  %s1334_s21 = scalar_lea.vmem %s1333_s14, 64 }
 0x427   : > { %p1335_p2 = scmp.lt.s32.totalorder %s1015_s9, %s1333_s14  ;;  %p1336_p0 = scmp.lt.s32.totalorder %s1334_s21, %s1328_s10 }
 0x428   : > { %p1331_p9 = pneg %p1330_p3 }
 0x429   : > { %p1337_p7 = por %p1336_p0, %p1335_p2 }
 0x42b   : > { %p1338_p13 = pnand %p1337_p7, %p1331_p9 }
 0x42d   : > { %1341 = shalt.err (!%p1338_p13)
}
 0x42e   : > { %s1342_s22 = scalar_lea.hbm %s2052_s18, 32  ;;  %s1346_s17 = scalar_lea.hbm %s2116_s4, 64 }
 0x42f   : > { %p1343_p1 = scmp.ne.s32.totalorder %s2052_s18, %s1342_s22  ;;  %p1347_p6 = scmp.lt.u32.totalorder %s2052_s18, %s2116_s4 }
 0x430   : > { %p1348_p8 = scmp.lt.u32.totalorder %s1346_s17, %s1342_s22  ;;  %p1350_p12 = scmp.lt.u32.totalorder %s1342_s22, %s2052_s18 }
 0x431   : > { %p1344_p4 = pnand %p1343_p1, %p2138_p11 }
 0x432   : > { %p1349_p10 = por %p1348_p8, %p1347_p6 }
 0x433   : > { %p1345_p5 = pneg %p1344_p4 }
 0x434   : > { %p1351_p3 = por %p1350_p12, %p1349_p10 }
 0x436   : > { %p1352_p9 = pnand %p1351_p3, %p1345_p5 }
 0x438   : > { %1355 = shalt.err (!%p1352_p9)
}
 0x439   : > { %1163 = dma.vmem_to_hbm [thread:$0]  (%p2138_p11), %s1015_s9, 32, %s2052_s18, %s1001_s12  }
 0x43a PF: > { %p1169_p2 = scmp.ge.s32.totalorder %s1454_s25, 2  ;;  %s1026_s29 = sand.u32 1, %s1414_s15  }
 0x43b   : > { %p2139_p0 = scmp.ne.s32.totalorder %s2135_s8, 0  ;;  %s1027_s6 = scalar_lea.sflag [#allocation9], %s1026_s29 }
 0x43d   : > { %p1166_p7 = pnand %p1169_p2, %p2139_p0 }
 0x43f   : > { %1409 = dma.done.wait (!%p1166_p7), %s1027_s6, 32  }
 0x440   : > { %1411 = vsyncadd (!%p1166_p7), %s1027_s6, 4294967264  ;;  %s23_s25 = sadd.s32 1, %s1454_s25   ;;  %s2140_s23 = sld [smem:[#allocation16_spill]] }
 0x441   : > { %p20_p13 = scmp.ge.s32.totalorder %s23_s25, 10   ;;  %s2141_s17 = sld [smem:[#allocation21_spill]] }
 0x442   : > { %s2142_s30 = sld [smem:[#allocation22_spill]]  ;;  %s2143_s21 = sld [smem:[#allocation17_spill]] }
 0x443   : > { %s2144_s22 = sld [smem:[#allocation18_spill]]  ;;  %s2145_s11 = sld [smem:[#allocation19_spill]] }
 0x444   : > { %s2146_s24 = sld [smem:[#allocation20_spill]]  ;;  %s2147_s15 = smov %s1418_s16 }
 0x445   : > { %s2149_s18 = smov %s1430_s19  ;;  %s2150_s19 = smov %s1434_s20 }
 0x446   : > { %s2148_s16 = smov %s2140_s23  ;;  %22 = sbr.rel (!%p20_p13) target bundleno = 11 (0xb), region = 110 }
 0x448   : > { %s2151_s20 = smov %s2142_s30 }
 0x449   : > { %s2152_s23 = smov %s2145_s11 }
 0x44d   :  { %1032 = vsyncpa [#allocation8], 1 }
 0x44e   :  { %1034 = vsyncpa [#allocation8 + $0x1], 1 }
 0x44f   :  { %1035 = vsyncpa [#allocation11], 1 }
 0x450   :  { %1037 = vsyncpa [#allocation11 + $0x1], 1 }
 0x451   :  { %1038 = vsyncpa [#allocation9], 1 }
 0x452   :  { %1040 = vsyncpa [#allocation9 + $0x1], 1 }

</bundles_post_ra>
